<compile_context>
chip_gen: v6e
topology: v6e:2x2x1
jax: 0.10.0
libtpu: 0.0.40
codegen_flags: <defaults>
</compile_context>

<pallas_src>
import math
import functools

import jax
import jax.numpy as jnp
from jax import lax
from jax.experimental import pallas as pl
from jax.experimental.pallas import tpu as pltpu


# ----------------------------- small helpers -----------------------------

def _layernorm(x, gamma, beta, eps=1e-5):        # eps matches nn.LayerNorm default
    mu = jnp.mean(x, axis=-1, keepdims=True)
    var = jnp.mean(jnp.square(x - mu), axis=-1, keepdims=True)
    return (x - mu) * lax.rsqrt(var + eps) * gamma + beta


def _const_block_spec(arr):
    """Full-array block whose index never changes across the grid (weight stays resident)."""
    n = arr.ndim
    return pl.BlockSpec(arr.shape, lambda b, _n=n: (0,) * _n)


def _pick_block_batch(B, S):
    """How many sequences to batch per grid step (sublane fill / per-step overhead amortisation)."""
    target_rows = 256
    bb = max(1, min(B, max(1, target_rows // max(S, 1))))
    while B % bb != 0:
        bb -= 1
    return bb


# --------------------------- transformer layer kernel -------------------------

def make_transformer_layer_kernel(n_head, d_qk, d_v):
    inv_temp = 1.0 / math.sqrt(d_qk)
    Hq, Hv = n_head * d_qk, n_head * d_v

    def kernel(x_ref, npq_ref, bq_ref, bk_ref,
               ln1_g_ref, ln1_b_ref, wqkv_ref, wo_ref, bo_ref,
               ln2_g_ref, ln2_b_ref, w1_ref, b1_ref, w2_ref, b2_ref,
               out_ref):
        x = x_ref[0].astype(jnp.float32)     # (Rb, D) = Bb flattened sequences (bf16 in HBM)
        Rb, D = x.shape
        npq = npq_ref[0]                     # (Rb, 1) f32, 1.0 = real event (query/output mask)
        bq = bq_ref[0]                       # (Rb, 1) i32 batch id per query row
        bk = bk_ref[0]                       # (1, Rb) i32 batch id per key (pad keys = -1)

        # Block-diagonal causal mask rebuilt in-kernel (no (B,S,S) HBM traffic):
        # same sequence  AND  key position <= query position  AND  key not padded (bk != -1).
        row = lax.broadcasted_iota(jnp.int32, (Rb, Rb), 0)
        col = lax.broadcasted_iota(jnp.int32, (Rb, Rb), 1)
        visible = jnp.logical_and(bq == bk, col <= row)              # (Rb, Rb) bool

        # ---------- multi-head self-attention (pre-norm + residual) ----------
        xn = _layernorm(x, ln1_g_ref[...], ln1_b_ref[...])
        qkv = jnp.dot(xn.astype(jnp.bfloat16), wqkv_ref[...],       # fused QKV matmul, bf16 MXU
                      preferred_element_type=jnp.float32)           # (Rb, 2*Hq + Hv) f32

        # Static per-head loop on column slices (no stack/concat relayout copies); the output
        # projection is folded into the loop: attn = sum_h ctx_h @ wo[h*d_v:(h+1)*d_v, :].
        attn = jnp.zeros((Rb, D), jnp.float32)
        for h in range(n_head):
            qh = qkv[:, h * d_qk:(h + 1) * d_qk].astype(jnp.bfloat16)
            kh = qkv[:, Hq + h * d_qk:Hq + (h + 1) * d_qk].astype(jnp.bfloat16)
            vh = qkv[:, 2 * Hq + h * d_v:2 * Hq + (h + 1) * d_v].astype(jnp.bfloat16)
            s = lax.dot_general(qh, kh, (((1,), (1,)), ((), ())),
                                preferred_element_type=jnp.float32) * inv_temp   # (Rb, Rb)
            s = jnp.where(visible, s, -1e9)
            s_max = jnp.max(s, axis=-1, keepdims=True)
            e = jnp.exp(s - s_max)
            a = e / jnp.sum(e, axis=-1, keepdims=True)               # exact div (PyTorch parity)
            ctx = jnp.dot(a.astype(jnp.bfloat16), vh,
                          preferred_element_type=jnp.float32)        # (Rb, d_v)
            wo_h = wo_ref[h * d_v:(h + 1) * d_v, :]                  # (d_v, D) bf16, static slice
            attn = attn + jnp.dot(ctx.astype(jnp.bfloat16), wo_h,
                                  preferred_element_type=jnp.float32)
        x = (x + attn + bo_ref[...]) * npq

        # ---------- position-wise feed-forward (pre-norm + residual) ----------
        yn = _layernorm(x, ln2_g_ref[...], ln2_b_ref[...])
        hidden = jnp.dot(yn.astype(jnp.bfloat16), w1_ref[...],
                         preferred_element_type=jnp.float32) + b1_ref[...]
        # TODO(synk): FFN activation assumed ReLU (TransformerLayer internals not shown in spec).
        hidden = jnp.maximum(hidden, 0.0)
        ff = jnp.dot(hidden.astype(jnp.bfloat16), w2_ref[...],
                     preferred_element_type=jnp.float32) + b2_ref[...]
        out_ref[0] = ((x + ff) * npq).astype(out_ref.dtype)          # bf16 inter-layer store

    return kernel


def transformer_layer(x3, npq, bq, bk, p, n_head, d_qk, d_v):
    nb, Rb, D = x3.shape
    Hq, Hv = n_head * d_qk, n_head * d_v
    d_hidden = p['w1'].shape[1]

    args = (x3, npq, bq, bk,
            p['ln1_g'], p['ln1_b'], p['wqkv'], p['wo'], p['bo'],
            p['ln2_g'], p['ln2_b'], p['w1'], p['b1'], p['w2'], p['b2'])

    in_specs = [pl.BlockSpec((1, Rb, D), lambda b: (b, 0, 0)),
                pl.BlockSpec((1, Rb, 1), lambda b: (b, 0, 0)),
                pl.BlockSpec((1, Rb, 1), lambda b: (b, 0, 0)),
                pl.BlockSpec((1, 1, Rb), lambda b: (b, 0, 0))]
    in_specs += [_const_block_spec(a) for a in args[4:]]

    flops = nb * (2 * Rb * D * (2 * Hq + Hv)               # fused QKV projection
                  + 2 * n_head * Rb * Rb * (d_qk + d_v)    # scores + attn @ V
                  + 2 * Rb * Hv * D                        # output projection
                  + 4 * Rb * D * d_hidden)                 # FFN
    bytes_accessed = int(sum(int(a.size) * a.dtype.itemsize for a in args) + nb * Rb * D * 2)

    return pl.pallas_call(
        make_transformer_layer_kernel(n_head, d_qk, d_v),
        out_shape=jax.ShapeDtypeStruct((nb, Rb, D), jnp.bfloat16),
        grid_spec=pltpu.PrefetchScalarGridSpec(
            num_scalar_prefetch=0,
            grid=(nb,),
            in_specs=in_specs,
            out_specs=pl.BlockSpec((1, Rb, D), lambda b: (b, 0, 0)),
        ),
        compiler_params=pltpu.CompilerParams(
            dimension_semantics=("parallel",),
            vmem_limit_bytes=32 * 1024 * 1024),
        cost_estimate=pl.CostEstimate(
            flops=int(flops),
            transcendentals=int(nb * n_head * Rb * Rb),
            bytes_accessed=bytes_accessed),
    )(*args)


# ------------------------------ LSTM + projection -----------------------------

def make_lstm_proj_kernel(d_rnn, block_batch, seq_len):
    dr, Bb, S = d_rnn, block_batch, seq_len
    unroll = S if S <= 8 else 8            # capped unroll: LLO visibility without vreg spills

    def kernel(x_ref, wih_ref, whh_ref, b_ref, wp_ref, bp_ref, out_ref,
               gx_s, hall_s, h_s, c_s):
        x = x_ref[0]                                    # (S*Bb, D) bf16, rows ordered (t, b)

        # Hoisted input matmul: one (S*Bb, D) x (D, 4*dr) MXU pass outside the recurrence.
        gx_s[...] = jnp.dot(x.astype(jnp.bfloat16), wih_ref[...],
                            preferred_element_type=jnp.float32) + b_ref[...]   # (S*Bb, 4*dr)

        h_s[...] = jnp.zeros_like(h_s)
        c_s[...] = jnp.zeros_like(c_s)

        def step(t, carry):
            start = t * Bb
            if Bb % 8 == 0:
                start = pl.multiple_of(start, 8)
            # Fused, lane-dense recurrent matmul: (Bb, dr) x (dr, 4*dr) per step; gates are
            # split afterwards with static slices (PyTorch gate order i, f, g, o).
            g = gx_s[pl.ds(start, Bb)] + jnp.dot(
                h_s[...].astype(jnp.bfloat16), whh_ref[...],
                preferred_element_type=jnp.float32)                  # (Bb, 4*dr)
            gi = jax.nn.sigmoid(g[:, 0 * dr:1 * dr])
            gf = jax.nn.sigmoid(g[:, 1 * dr:2 * dr])
            gg = jnp.tanh(g[:, 2 * dr:3 * dr])
            go = jax.nn.sigmoid(g[:, 3 * dr:4 * dr])
            c = gf * c_s[...] + gi * gg
            h = go * jnp.tanh(c)
            c_s[...] = c
            h_s[...] = h
            hall_s[pl.ds(start, Bb), :] = h
            return carry

        lax.fori_loop(0, S, step, 0, unroll=unroll)

        # Hoisted output projection: one (S*Bb, dr) x (dr, d_model) matmul + a single store.
        out_ref[0] = (jnp.dot(hall_s[...].astype(jnp.bfloat16), wp_ref[...],
                              preferred_element_type=jnp.float32) + bp_ref[...])

    return kernel


def lstm_projection(x_tm, p, d_rnn, block_batch, seq_len):
    nb, RS, D = x_tm.shape                  # RS = seq_len * block_batch, rows ordered (t, b)
    dr = d_rnn
    d_model = p['wp'].shape[1]

    args = (x_tm, p['wih'], p['whh'], p['b'], p['wp'], p['bp'])
    in_specs = [pl.BlockSpec((1, RS, D), lambda b: (b, 0, 0))]
    in_specs += [_const_block_spec(a) for a in args[1:]]

    return pl.pallas_call(
        make_lstm_proj_kernel(d_rnn, block_batch, seq_len),
        out_shape=jax.ShapeDtypeStruct((nb, RS, d_model), jnp.float32),
        grid_spec=pltpu.PrefetchScalarGridSpec(
            num_scalar_prefetch=0,
            grid=(nb,),
            in_specs=in_specs,
            out_specs=pl.BlockSpec((1, RS, d_model), lambda b: (b, 0, 0)),
            scratch_shapes=[pltpu.VMEM((RS, 4 * dr), jnp.float32),        # gate pre-activations
                            pltpu.VMEM((RS, dr), jnp.float32),            # all hidden states
                            pltpu.VMEM((block_batch, dr), jnp.float32),   # h carry (row-batched)
                            pltpu.VMEM((block_batch, dr), jnp.float32)],  # c carry (row-batched)
        ),
        compiler_params=pltpu.CompilerParams(
            dimension_semantics=("parallel",),
            vmem_limit_bytes=32 * 1024 * 1024),
    )(*args)


# --------------------------------- glue (JAX) ---------------------------------

def biased_positional_embedding(event_time, wt, d_input):
    B, S = event_time.shape
    # TODO(synk): sin/cos halves are concatenated (BiasedPositionalEmbedding source not in
    # spec; an interleaved even/odd layout would need a different assembly here).
    phi = event_time[:, :, None] * wt[None, None, :]                 # Wt: Linear(1, d/2, no bias)
    position = jnp.arange(S, dtype=jnp.float32)[:, None]             # (S, 1)
    div_term = jnp.exp(jnp.arange(0, d_input, 2, dtype=jnp.float32)
                       * -(math.log(10000.0) / d_input))             # (d/2,)
    arc = (position * div_term)[None, :, :]                          # (1, S, d/2)
    return jnp.concatenate([jnp.sin(arc + phi), jnp.cos(arc + phi)], axis=-1)


def transformer_encoder_forward(prepared, event_time, event_type, non_pad_mask,
                                *, n_head, d_qk, d_v, d_rnn):
    d_input = prepared['event_emb'].shape[1]
    B, S = event_time.shape
    Bb = _pick_block_batch(B, S)
    nb, Rb = B // Bb, Bb * S

    # embeddings (cheap gather / sin-cos done in plain JAX)
    time_emb = biased_positional_embedding(event_time, prepared['wt'], d_input)
    events_emb = jnp.take(prepared['event_emb'], event_type, axis=0)  # padding_idx row is zeros
    x = (time_emb + events_emb).astype(jnp.bfloat16)                  # bf16 inter-layer activations

    # flattened (Bb*S, D) token blocks; the dense (B,S,S) mask is rebuilt inside the kernel
    # from these tiny per-token vectors (query pad, query batch-id, key batch-id/pad).
    x3 = x.reshape(nb, Rb, d_input)
    npm = non_pad_mask.astype(jnp.float32)                            # (B, S)
    npq = npm.reshape(nb, Rb, 1)
    bid = jnp.repeat(jnp.arange(B, dtype=jnp.int32), S)               # batch id per token
    bq = bid.reshape(nb, Rb, 1)
    bk = jnp.where(npm.reshape(-1) > 0, bid, -1).reshape(nb, 1, Rb)   # pad keys -> -1

    for lp in prepared['layers']:
        x3 = transformer_layer(x3, npq, bq, bk, lp, n_head, d_qk, d_v)

    # LSTM consumes time-major row blocks (rows ordered (t, batch) inside each block) so the
    # recurrence carries a (Bb, d_rnn) state and the t-th rows are one contiguous slice.
    x_tm = (x3.reshape(nb, Bb, S, d_input)
              .transpose(0, 2, 1, 3)
              .reshape(nb, S * Bb, d_input))
    out_tm = lstm_projection(x_tm, prepared['lstm'], d_rnn, Bb, S)
    return (out_tm.reshape(nb, S, Bb, d_input)
                  .transpose(0, 2, 1, 3)
                  .reshape(B, S, d_input))


def prepare_params(params):
    """One-time weight preparation (fused QKV, fused LSTM bias, bf16 MXU operands).
    Hoisted out of the per-layer wrappers so no prep XLA ops run per layer per forward."""
    prepared = dict(wt=params['wt'], event_emb=params['event_emb'])
    layers = []
    for lp in params['layers']:
        layers.append(dict(
            ln1_g=lp['ln1_g'], ln1_b=lp['ln1_b'],
            wqkv=jnp.concatenate([lp['wq'], lp['wk'], lp['wv']], axis=1).astype(jnp.bfloat16),
            wo=lp['wo'].astype(jnp.bfloat16), bo=lp['bo'],
            ln2_g=lp['ln2_g'], ln2_b=lp['ln2_b'],
            w1=lp['w1'].astype(jnp.bfloat16), b1=lp['b1'],
            w2=lp['w2'].astype(jnp.bfloat16), b2=lp['b2'],
        ))
    prepared['layers'] = layers
    lstm = params['lstm']
    prepared['lstm'] = dict(
        wih=lstm['wih'].astype(jnp.bfloat16),
        whh=lstm['whh'].astype(jnp.bfloat16),
        b=(lstm['bih'] + lstm['bhh']).astype(jnp.float32),
        wp=lstm['wp'].astype(jnp.bfloat16),
        bp=lstm['bp'],
    )
    return prepared


def init_params(key, num_types, d_input, d_rnn, d_hidden, n_layers, n_head, d_qk, d_v):
    keys = iter(jax.random.split(key, 128))
    nrm = lambda shape, s=0.05: s * jax.random.normal(next(keys), shape, dtype=jnp.float32)

    params = {}
    params['wt'] = nrm((d_input // 2,))                              # BiasedPositionalEmbedding.Wt
    emb = nrm((num_types + 1, d_input))
    params['event_emb'] = emb.at[num_types].set(0.0)                 # padding_idx = num_types

    layers = []
    for _ in range(n_layers):
        layers.append(dict(
            ln1_g=jnp.ones((1, d_input), jnp.float32), ln1_b=jnp.zeros((1, d_input), jnp.float32),
            wq=nrm((d_input, n_head * d_qk)),
            wk=nrm((d_input, n_head * d_qk)),
            wv=nrm((d_input, n_head * d_v)),
            wo=nrm((n_head * d_v, d_input)), bo=jnp.zeros((1, d_input), jnp.float32),
            ln2_g=jnp.ones((1, d_input), jnp.float32), ln2_b=jnp.zeros((1, d_input), jnp.float32),
            w1=nrm((d_input, d_hidden)), b1=jnp.zeros((1, d_hidden), jnp.float32),
            w2=nrm((d_hidden, d_input)), b2=jnp.zeros((1, d_input), jnp.float32),
        ))
    params['layers'] = layers

    # NOTE: PyTorch nn.LSTM stores weight_ih/weight_hh as (4*hidden, in); importing a real
    # checkpoint requires transposing into this (in, 4*hidden) layout (gate order i,f,g,o kept).
    params['lstm'] = dict(
        wih=nrm((d_input, 4 * d_rnn)),
        whh=nrm((d_rnn, 4 * d_rnn)),
        bih=jnp.zeros((1, 4 * d_rnn), jnp.float32),
        bhh=jnp.zeros((1, 4 * d_rnn), jnp.float32),
        wp=nrm((d_rnn, d_input)),
        bp=jnp.zeros((1, d_input), jnp.float32),
    )
    return params


# ------------------------------------ main ------------------------------------

if __name__ == "__main__":
    num_types, d_input, d_rnn, d_hidden = 5, 32, 32, 64
    n_layers, n_head, d_qk, d_v = 2, 2, 16, 16
    B, S = 2, 8

    key = jax.random.PRNGKey(0)
    kp, kt, ke = jax.random.split(key, 3)
    params = init_params(kp, num_types, d_input, d_rnn, d_hidden,
                         n_layers, n_head, d_qk, d_v)
    prepared = prepare_params(params)        # one-time weight prep, hoisted out of forward

    event_time = jax.random.uniform(kt, (B, S), jnp.float32, 0.0, 2.0)
    event_type = jax.random.randint(ke, (B, S), 0, num_types)
    non_pad_mask = jnp.ones((B, S), jnp.float32).at[1, S - 2:].set(0.0)
    event_type = jnp.where(non_pad_mask > 0, event_type, num_types).astype(jnp.int32)

    fwd = jax.jit(functools.partial(transformer_encoder_forward,
                                    n_head=n_head, d_qk=d_qk, d_v=d_v, d_rnn=d_rnn))
    out = jax.block_until_ready(fwd(prepared, event_time, event_type, non_pad_mask))
    assert out.shape == (B, S, d_input) and out.dtype == jnp.float32
    print("KERNEL_OK")
</pallas_src>

<mosaic_0001>
module attributes {stable_mosaic.version = 11 : i64} {
  func.func @kernel(%arg0: i32, %arg1: memref<1x16x32xbf16, #tpu.memory_space<vmem>>, %arg2: memref<1x16x1xf32, #tpu.memory_space<vmem>>, %arg3: memref<1x16x1xi32, #tpu.memory_space<vmem>>, %arg4: memref<1x1x16xi32, #tpu.memory_space<vmem>>, %arg5: memref<1x32xf32, #tpu.memory_space<vmem>>, %arg6: memref<1x32xf32, #tpu.memory_space<vmem>>, %arg7: memref<32x96xbf16, #tpu.memory_space<vmem>>, %arg8: memref<32x32xbf16, #tpu.memory_space<vmem>>, %arg9: memref<1x32xf32, #tpu.memory_space<vmem>>, %arg10: memref<1x32xf32, #tpu.memory_space<vmem>>, %arg11: memref<1x32xf32, #tpu.memory_space<vmem>>, %arg12: memref<32x64xbf16, #tpu.memory_space<vmem>>, %arg13: memref<1x64xf32, #tpu.memory_space<vmem>>, %arg14: memref<64x32xbf16, #tpu.memory_space<vmem>>, %arg15: memref<1x32xf32, #tpu.memory_space<vmem>>, %arg16: memref<1x16x32xbf16, #tpu.memory_space<vmem>>) attributes {dimension_semantics = [#tpu.dimension_semantics<parallel>], iteration_bounds = array<i64: 1>, scalar_prefetch = 0 : i64, scratch_operands = 0 : i64, tpu.core_type = #tpu.core_type<tc>, window_params = [{transform_indices = @transform_0, window_bounds = array<i64: 1, 16, 32>}, {transform_indices = @transform_1, window_bounds = array<i64: 1, 16, 1>}, {transform_indices = @transform_2, window_bounds = array<i64: 1, 16, 1>}, {transform_indices = @transform_3, window_bounds = array<i64: 1, 1, 16>}, {pipeline_mode = #tpu.pipeline_mode<synchronous>, transform_indices = @transform_4, window_bounds = array<i64: 1, 32>}, {pipeline_mode = #tpu.pipeline_mode<synchronous>, transform_indices = @transform_5, window_bounds = array<i64: 1, 32>}, {pipeline_mode = #tpu.pipeline_mode<synchronous>, transform_indices = @transform_6, window_bounds = array<i64: 32, 96>}, {pipeline_mode = #tpu.pipeline_mode<synchronous>, transform_indices = @transform_7, window_bounds = array<i64: 32, 32>}, {pipeline_mode = #tpu.pipeline_mode<synchronous>, transform_indices = @transform_8, window_bounds = array<i64: 1, 32>}, {pipeline_mode = #tpu.pipeline_mode<synchronous>, transform_indices = @transform_9, window_bounds = array<i64: 1, 32>}, {pipeline_mode = #tpu.pipeline_mode<synchronous>, transform_indices = @transform_10, window_bounds = array<i64: 1, 32>}, {pipeline_mode = #tpu.pipeline_mode<synchronous>, transform_indices = @transform_11, window_bounds = array<i64: 32, 64>}, {pipeline_mode = #tpu.pipeline_mode<synchronous>, transform_indices = @transform_12, window_bounds = array<i64: 1, 64>}, {pipeline_mode = #tpu.pipeline_mode<synchronous>, transform_indices = @transform_13, window_bounds = array<i64: 64, 32>}, {pipeline_mode = #tpu.pipeline_mode<synchronous>, transform_indices = @transform_14, window_bounds = array<i64: 1, 32>}, {transform_indices = @transform_15, window_bounds = array<i64: 1, 16, 32>}]} {
    %c0 = arith.constant 0 : index
    %c0_0 = arith.constant 0 : index
    %c0_1 = arith.constant 0 : index
    %0 = vector.load %arg1[%c0, %c0_0, %c0_1] : memref<1x16x32xbf16, #tpu.memory_space<vmem>>, vector<1x16x32xbf16>
    %1 = vector.shape_cast %0 : vector<1x16x32xbf16> to vector<16x32xbf16>
    %2 = arith.extf %1 : vector<16x32xbf16> to vector<16x32xf32>
    %c0_2 = arith.constant 0 : index
    %c0_3 = arith.constant 0 : index
    %c0_4 = arith.constant 0 : index
    %3 = vector.load %arg2[%c0_2, %c0_3, %c0_4] : memref<1x16x1xf32, #tpu.memory_space<vmem>>, vector<1x16x1xf32>
    %4 = vector.shape_cast %3 : vector<1x16x1xf32> to vector<16x1xf32>
    %c0_5 = arith.constant 0 : index
    %c0_6 = arith.constant 0 : index
    %c0_7 = arith.constant 0 : index
    %5 = vector.load %arg3[%c0_5, %c0_6, %c0_7] : memref<1x16x1xi32, #tpu.memory_space<vmem>>, vector<1x16x1xi32>
    %6 = vector.shape_cast %5 : vector<1x16x1xi32> to vector<16x1xi32>
    %c0_8 = arith.constant 0 : index
    %c0_9 = arith.constant 0 : index
    %c0_10 = arith.constant 0 : index
    %7 = vector.load %arg4[%c0_8, %c0_9, %c0_10] : memref<1x1x16xi32, #tpu.memory_space<vmem>>, vector<1x1x16xi32>
    %8 = vector.shape_cast %7 : vector<1x1x16xi32> to vector<1x16xi32>
    %9 = tpu.iota {dimensions = array<i32: 0>} : vector<16x16xi32>
    %10 = tpu.iota {dimensions = array<i32: 1>} : vector<16x16xi32>
    %11 = vector.broadcast %6 : vector<16x1xi32> to vector<16x16xi32>
    %12 = vector.broadcast %8 : vector<1x16xi32> to vector<16x16xi32>
    %13 = arith.cmpi eq, %11, %12 : vector<16x16xi32>
    %14 = arith.cmpi sle, %10, %9 : vector<16x16xi32>
    %15 = arith.andi %13, %14 : vector<16x16xi1>
    %c0_11 = arith.constant 0 : index
    %c0_12 = arith.constant 0 : index
    %16 = vector.load %arg5[%c0_11, %c0_12] : memref<1x32xf32, #tpu.memory_space<vmem>>, vector<1x32xf32>
    %c0_13 = arith.constant 0 : index
    %c0_14 = arith.constant 0 : index
    %17 = vector.load %arg6[%c0_13, %c0_14] : memref<1x32xf32, #tpu.memory_space<vmem>>, vector<1x32xf32>
    %cst = arith.constant dense<0.000000e+00> : vector<16xf32>
    %18 = vector.multi_reduction <add>, %2, %cst [1] : vector<16x32xf32> to vector<16xf32>
    %19 = vector.shape_cast %18 : vector<16xf32> to vector<16x1xf32>
    %cst_15 = arith.constant 3.200000e+01 : f32
    %20 = vector.broadcast %cst_15 : f32 to vector<16x1xf32>
    %21 = arith.divf %19, %20 : vector<16x1xf32>
    %22 = vector.broadcast %21 : vector<16x1xf32> to vector<16x32xf32>
    %23 = arith.subf %2, %22 : vector<16x32xf32>
    %24 = arith.mulf %23, %23 : vector<16x32xf32>
    %cst_16 = arith.constant dense<0.000000e+00> : vector<16xf32>
    %25 = vector.multi_reduction <add>, %24, %cst_16 [1] : vector<16x32xf32> to vector<16xf32>
    %26 = vector.shape_cast %25 : vector<16xf32> to vector<16x1xf32>
    %cst_17 = arith.constant 3.200000e+01 : f32
    %27 = vector.broadcast %cst_17 : f32 to vector<16x1xf32>
    %28 = arith.divf %26, %27 : vector<16x1xf32>
    %29 = vector.broadcast %21 : vector<16x1xf32> to vector<16x32xf32>
    %30 = arith.subf %2, %29 : vector<16x32xf32>
    %cst_18 = arith.constant 9.99999974E-6 : f32
    %31 = vector.broadcast %cst_18 : f32 to vector<16x1xf32>
    %32 = arith.addf %28, %31 : vector<16x1xf32>
    %33 = math.rsqrt %32 : vector<16x1xf32>
    %34 = vector.broadcast %33 : vector<16x1xf32> to vector<16x32xf32>
    %35 = arith.mulf %30, %34 : vector<16x32xf32>
    %36 = vector.broadcast %16 : vector<1x32xf32> to vector<16x32xf32>
    %37 = arith.mulf %35, %36 : vector<16x32xf32>
    %38 = vector.broadcast %17 : vector<1x32xf32> to vector<16x32xf32>
    %39 = arith.addf %37, %38 : vector<16x32xf32>
    %40 = arith.truncf %39 : vector<16x32xf32> to vector<16x32xbf16>
    %c0_19 = arith.constant 0 : index
    %c0_20 = arith.constant 0 : index
    %41 = vector.load %arg7[%c0_19, %c0_20] : memref<32x96xbf16, #tpu.memory_space<vmem>>, vector<32x96xbf16>
    %cst_21 = arith.constant dense<0.000000e+00> : vector<16x96xf32>
    %42 = tpu.matmul %40, %41, %cst_21 {dimension_numbers = #tpu.dot_dimension_numbers<[1], [0], [0], [1], [0, 0, 1, 1], [], []>} : vector<16x32xbf16>, vector<32x96xbf16>, vector<16x96xf32> -> vector<16x96xf32>
    %cst_22 = arith.constant 0.000000e+00 : f32
    %43 = vector.broadcast %cst_22 : f32 to vector<16x32xf32>
    %44 = vector.extract_strided_slice %42 {offsets = [0, 0], sizes = [16, 16], strides = [1, 1]} : vector<16x96xf32> to vector<16x16xf32>
    %45 = arith.truncf %44 : vector<16x16xf32> to vector<16x16xbf16>
    %46 = vector.extract_strided_slice %42 {offsets = [0, 32], sizes = [16, 16], strides = [1, 1]} : vector<16x96xf32> to vector<16x16xf32>
    %47 = arith.truncf %46 : vector<16x16xf32> to vector<16x16xbf16>
    %48 = vector.extract_strided_slice %42 {offsets = [0, 64], sizes = [16, 16], strides = [1, 1]} : vector<16x96xf32> to vector<16x16xf32>
    %49 = arith.truncf %48 : vector<16x16xf32> to vector<16x16xbf16>
    %cst_23 = arith.constant dense<0.000000e+00> : vector<16x16xf32>
    %50 = tpu.matmul %45, %47, %cst_23 {dimension_numbers = #tpu.dot_dimension_numbers<[1], [1], [0], [0], [0, 0, 1, 0], [], []>} : vector<16x16xbf16>, vector<16x16xbf16>, vector<16x16xf32> -> vector<16x16xf32>
    %cst_24 = arith.constant 2.500000e-01 : f32
    %51 = vector.broadcast %cst_24 : f32 to vector<16x16xf32>
    %52 = arith.mulf %50, %51 : vector<16x16xf32>
    %cst_25 = arith.constant -1.000000e+09 : f32
    %53 = vector.broadcast %cst_25 : f32 to vector<16x16xf32>
    %54 = arith.select %15, %52, %53 : vector<16x16xi1>, vector<16x16xf32>
    %cst_26 = arith.constant dense<0xFF800000> : vector<16xf32>
    %55 = vector.multi_reduction <maximumf>, %54, %cst_26 [1] : vector<16x16xf32> to vector<16xf32>
    %56 = vector.shape_cast %55 : vector<16xf32> to vector<16x1xf32>
    %57 = vector.broadcast %56 : vector<16x1xf32> to vector<16x16xf32>
    %58 = arith.subf %54, %57 : vector<16x16xf32>
    %59 = math.exp %58 : vector<16x16xf32>
    %cst_27 = arith.constant dense<0.000000e+00> : vector<16xf32>
    %60 = vector.multi_reduction <add>, %59, %cst_27 [1] : vector<16x16xf32> to vector<16xf32>
    %61 = vector.shape_cast %60 : vector<16xf32> to vector<16x1xf32>
    %62 = vector.broadcast %61 : vector<16x1xf32> to vector<16x16xf32>
    %63 = arith.divf %59, %62 : vector<16x16xf32>
    %64 = arith.truncf %63 : vector<16x16xf32> to vector<16x16xbf16>
    %cst_28 = arith.constant dense<0.000000e+00> : vector<16x16xf32>
    %65 = tpu.matmul %64, %49, %cst_28 {dimension_numbers = #tpu.dot_dimension_numbers<[1], [0], [0], [1], [0, 0, 1, 1], [], []>} : vector<16x16xbf16>, vector<16x16xbf16>, vector<16x16xf32> -> vector<16x16xf32>
    %c0_29 = arith.constant 0 : index
    %c0_30 = arith.constant 0 : index
    %66 = vector.load %arg8[%c0_29, %c0_30] : memref<32x32xbf16, #tpu.memory_space<vmem>>, vector<16x32xbf16>
    %67 = arith.truncf %65 : vector<16x16xf32> to vector<16x16xbf16>
    %cst_31 = arith.constant dense<0.000000e+00> : vector<16x32xf32>
    %68 = tpu.matmul %67, %66, %cst_31 {dimension_numbers = #tpu.dot_dimension_numbers<[1], [0], [0], [1], [0, 0, 1, 1], [], []>} : vector<16x16xbf16>, vector<16x32xbf16>, vector<16x32xf32> -> vector<16x32xf32>
    %69 = arith.addf %43, %68 : vector<16x32xf32>
    %70 = vector.extract_strided_slice %42 {offsets = [0, 16], sizes = [16, 16], strides = [1, 1]} : vector<16x96xf32> to vector<16x16xf32>
    %71 = arith.truncf %70 : vector<16x16xf32> to vector<16x16xbf16>
    %72 = vector.extract_strided_slice %42 {offsets = [0, 48], sizes = [16, 16], strides = [1, 1]} : vector<16x96xf32> to vector<16x16xf32>
    %73 = arith.truncf %72 : vector<16x16xf32> to vector<16x16xbf16>
    %74 = vector.extract_strided_slice %42 {offsets = [0, 80], sizes = [16, 16], strides = [1, 1]} : vector<16x96xf32> to vector<16x16xf32>
    %75 = arith.truncf %74 : vector<16x16xf32> to vector<16x16xbf16>
    %cst_32 = arith.constant dense<0.000000e+00> : vector<16x16xf32>
    %76 = tpu.matmul %71, %73, %cst_32 {dimension_numbers = #tpu.dot_dimension_numbers<[1], [1], [0], [0], [0, 0, 1, 0], [], []>} : vector<16x16xbf16>, vector<16x16xbf16>, vector<16x16xf32> -> vector<16x16xf32>
    %cst_33 = arith.constant 2.500000e-01 : f32
    %77 = vector.broadcast %cst_33 : f32 to vector<16x16xf32>
    %78 = arith.mulf %76, %77 : vector<16x16xf32>
    %cst_34 = arith.constant -1.000000e+09 : f32
    %79 = vector.broadcast %cst_34 : f32 to vector<16x16xf32>
    %80 = arith.select %15, %78, %79 : vector<16x16xi1>, vector<16x16xf32>
    %cst_35 = arith.constant dense<0xFF800000> : vector<16xf32>
    %81 = vector.multi_reduction <maximumf>, %80, %cst_35 [1] : vector<16x16xf32> to vector<16xf32>
    %82 = vector.shape_cast %81 : vector<16xf32> to vector<16x1xf32>
    %83 = vector.broadcast %82 : vector<16x1xf32> to vector<16x16xf32>
    %84 = arith.subf %80, %83 : vector<16x16xf32>
    %85 = math.exp %84 : vector<16x16xf32>
    %cst_36 = arith.constant dense<0.000000e+00> : vector<16xf32>
    %86 = vector.multi_reduction <add>, %85, %cst_36 [1] : vector<16x16xf32> to vector<16xf32>
    %87 = vector.shape_cast %86 : vector<16xf32> to vector<16x1xf32>
    %88 = vector.broadcast %87 : vector<16x1xf32> to vector<16x16xf32>
    %89 = arith.divf %85, %88 : vector<16x16xf32>
    %90 = arith.truncf %89 : vector<16x16xf32> to vector<16x16xbf16>
    %cst_37 = arith.constant dense<0.000000e+00> : vector<16x16xf32>
    %91 = tpu.matmul %90, %75, %cst_37 {dimension_numbers = #tpu.dot_dimension_numbers<[1], [0], [0], [1], [0, 0, 1, 1], [], []>} : vector<16x16xbf16>, vector<16x16xbf16>, vector<16x16xf32> -> vector<16x16xf32>
    %c16 = arith.constant 16 : index
    %c0_38 = arith.constant 0 : index
    %92 = vector.load %arg8[%c16, %c0_38] : memref<32x32xbf16, #tpu.memory_space<vmem>>, vector<16x32xbf16>
    %93 = arith.truncf %91 : vector<16x16xf32> to vector<16x16xbf16>
    %cst_39 = arith.constant dense<0.000000e+00> : vector<16x32xf32>
    %94 = tpu.matmul %93, %92, %cst_39 {dimension_numbers = #tpu.dot_dimension_numbers<[1], [0], [0], [1], [0, 0, 1, 1], [], []>} : vector<16x16xbf16>, vector<16x32xbf16>, vector<16x32xf32> -> vector<16x32xf32>
    %95 = arith.addf %69, %94 : vector<16x32xf32>
    %96 = arith.addf %2, %95 : vector<16x32xf32>
    %c0_40 = arith.constant 0 : index
    %c0_41 = arith.constant 0 : index
    %97 = vector.load %arg9[%c0_40, %c0_41] : memref<1x32xf32, #tpu.memory_space<vmem>>, vector<1x32xf32>
    %98 = vector.broadcast %97 : vector<1x32xf32> to vector<16x32xf32>
    %99 = arith.addf %96, %98 : vector<16x32xf32>
    %100 = vector.broadcast %4 : vector<16x1xf32> to vector<16x32xf32>
    %101 = arith.mulf %99, %100 : vector<16x32xf32>
    %c0_42 = arith.constant 0 : index
    %c0_43 = arith.constant 0 : index
    %102 = vector.load %arg10[%c0_42, %c0_43] : memref<1x32xf32, #tpu.memory_space<vmem>>, vector<1x32xf32>
    %c0_44 = arith.constant 0 : index
    %c0_45 = arith.constant 0 : index
    %103 = vector.load %arg11[%c0_44, %c0_45] : memref<1x32xf32, #tpu.memory_space<vmem>>, vector<1x32xf32>
    %cst_46 = arith.constant dense<0.000000e+00> : vector<16xf32>
    %104 = vector.multi_reduction <add>, %101, %cst_46 [1] : vector<16x32xf32> to vector<16xf32>
    %105 = vector.shape_cast %104 : vector<16xf32> to vector<16x1xf32>
    %cst_47 = arith.constant 3.200000e+01 : f32
    %106 = vector.broadcast %cst_47 : f32 to vector<16x1xf32>
    %107 = arith.divf %105, %106 : vector<16x1xf32>
    %108 = vector.broadcast %107 : vector<16x1xf32> to vector<16x32xf32>
    %109 = arith.subf %101, %108 : vector<16x32xf32>
    %110 = arith.mulf %109, %109 : vector<16x32xf32>
    %cst_48 = arith.constant dense<0.000000e+00> : vector<16xf32>
    %111 = vector.multi_reduction <add>, %110, %cst_48 [1] : vector<16x32xf32> to vector<16xf32>
    %112 = vector.shape_cast %111 : vector<16xf32> to vector<16x1xf32>
    %cst_49 = arith.constant 3.200000e+01 : f32
    %113 = vector.broadcast %cst_49 : f32 to vector<16x1xf32>
    %114 = arith.divf %112, %113 : vector<16x1xf32>
    %115 = vector.broadcast %107 : vector<16x1xf32> to vector<16x32xf32>
    %116 = arith.subf %101, %115 : vector<16x32xf32>
    %cst_50 = arith.constant 9.99999974E-6 : f32
    %117 = vector.broadcast %cst_50 : f32 to vector<16x1xf32>
    %118 = arith.addf %114, %117 : vector<16x1xf32>
    %119 = math.rsqrt %118 : vector<16x1xf32>
    %120 = vector.broadcast %119 : vector<16x1xf32> to vector<16x32xf32>
    %121 = arith.mulf %116, %120 : vector<16x32xf32>
    %122 = vector.broadcast %102 : vector<1x32xf32> to vector<16x32xf32>
    %123 = arith.mulf %121, %122 : vector<16x32xf32>
    %124 = vector.broadcast %103 : vector<1x32xf32> to vector<16x32xf32>
    %125 = arith.addf %123, %124 : vector<16x32xf32>
    %126 = arith.truncf %125 : vector<16x32xf32> to vector<16x32xbf16>
    %c0_51 = arith.constant 0 : index
    %c0_52 = arith.constant 0 : index
    %127 = vector.load %arg12[%c0_51, %c0_52] : memref<32x64xbf16, #tpu.memory_space<vmem>>, vector<32x64xbf16>
    %cst_53 = arith.constant dense<0.000000e+00> : vector<16x64xf32>
    %128 = tpu.matmul %126, %127, %cst_53 {dimension_numbers = #tpu.dot_dimension_numbers<[1], [0], [0], [1], [0, 0, 1, 1], [], []>} : vector<16x32xbf16>, vector<32x64xbf16>, vector<16x64xf32> -> vector<16x64xf32>
    %c0_54 = arith.constant 0 : index
    %c0_55 = arith.constant 0 : index
    %129 = vector.load %arg13[%c0_54, %c0_55] : memref<1x64xf32, #tpu.memory_space<vmem>>, vector<1x64xf32>
    %130 = vector.broadcast %129 : vector<1x64xf32> to vector<16x64xf32>
    %131 = arith.addf %128, %130 : vector<16x64xf32>
    %cst_56 = arith.constant 0.000000e+00 : f32
    %132 = vector.broadcast %cst_56 : f32 to vector<16x64xf32>
    %133 = arith.maximumf %131, %132 : vector<16x64xf32>
    %134 = arith.truncf %133 : vector<16x64xf32> to vector<16x64xbf16>
    %c0_57 = arith.constant 0 : index
    %c0_58 = arith.constant 0 : index
    %135 = vector.load %arg14[%c0_57, %c0_58] : memref<64x32xbf16, #tpu.memory_space<vmem>>, vector<64x32xbf16>
    %cst_59 = arith.constant dense<0.000000e+00> : vector<16x32xf32>
    %136 = tpu.matmul %134, %135, %cst_59 {dimension_numbers = #tpu.dot_dimension_numbers<[1], [0], [0], [1], [0, 0, 1, 1], [], []>} : vector<16x64xbf16>, vector<64x32xbf16>, vector<16x32xf32> -> vector<16x32xf32>
    %c0_60 = arith.constant 0 : index
    %c0_61 = arith.constant 0 : index
    %137 = vector.load %arg15[%c0_60, %c0_61] : memref<1x32xf32, #tpu.memory_space<vmem>>, vector<1x32xf32>
    %138 = vector.broadcast %137 : vector<1x32xf32> to vector<16x32xf32>
    %139 = arith.addf %136, %138 : vector<16x32xf32>
    %140 = arith.addf %101, %139 : vector<16x32xf32>
    %141 = vector.broadcast %4 : vector<16x1xf32> to vector<16x32xf32>
    %142 = arith.mulf %140, %141 : vector<16x32xf32>
    %143 = arith.truncf %142 : vector<16x32xf32> to vector<16x32xbf16>
    %c0_62 = arith.constant 0 : index
    %c0_63 = arith.constant 0 : index
    %c0_64 = arith.constant 0 : index
    %144 = vector.load %arg16[%c0_62, %c0_63, %c0_64] : memref<1x16x32xbf16, #tpu.memory_space<vmem>>, vector<1x16x32xbf16>
    %145 = vector.shape_cast %144 : vector<1x16x32xbf16> to vector<16x32xbf16>
    %146 = vector.shape_cast %143 : vector<16x32xbf16> to vector<1x16x32xbf16>
    tpu.vector_store %arg16[%c0_62, %c0_63, %c0_64], %146 {strides = array<i32>} : memref<1x16x32xbf16, #tpu.memory_space<vmem>>, vector<1x16x32xbf16>,
    return
  }
  func.func @transform_0(%arg0: i32) -> (i32, i32, i32) {
    %c0_i32 = arith.constant 0 : i32
    %c0_i32_0 = arith.constant 0 : i32
    %c0_i32_1 = arith.constant 0 : i32
    return %arg0, %c0_i32, %c0_i32_0 : i32, i32, i32
  }
  func.func @transform_1(%arg0: i32) -> (i32, i32, i32) {
    %c0_i32 = arith.constant 0 : i32
    %c0_i32_0 = arith.constant 0 : i32
    %c0_i32_1 = arith.constant 0 : i32
    return %arg0, %c0_i32, %c0_i32_0 : i32, i32, i32
  }
  func.func @transform_2(%arg0: i32) -> (i32, i32, i32) {
    %c0_i32 = arith.constant 0 : i32
    %c0_i32_0 = arith.constant 0 : i32
    %c0_i32_1 = arith.constant 0 : i32
    return %arg0, %c0_i32, %c0_i32_0 : i32, i32, i32
  }
  func.func @transform_3(%arg0: i32) -> (i32, i32, i32) {
    %c0_i32 = arith.constant 0 : i32
    %c0_i32_0 = arith.constant 0 : i32
    %c0_i32_1 = arith.constant 0 : i32
    return %arg0, %c0_i32, %c0_i32_0 : i32, i32, i32
  }
  func.func @transform_4(%arg0: i32) -> (i32, i32) {
    %c0_i32 = arith.constant 0 : i32
    %c0_i32_0 = arith.constant 0 : i32
    %c0_i32_1 = arith.constant 0 : i32
    return %c0_i32, %c0_i32_0 : i32, i32
  }
  func.func @transform_5(%arg0: i32) -> (i32, i32) {
    %c0_i32 = arith.constant 0 : i32
    %c0_i32_0 = arith.constant 0 : i32
    %c0_i32_1 = arith.constant 0 : i32
    return %c0_i32, %c0_i32_0 : i32, i32
  }
  func.func @transform_6(%arg0: i32) -> (i32, i32) {
    %c0_i32 = arith.constant 0 : i32
    %c0_i32_0 = arith.constant 0 : i32
    %c0_i32_1 = arith.constant 0 : i32
    return %c0_i32, %c0_i32_0 : i32, i32
  }
  func.func @transform_7(%arg0: i32) -> (i32, i32) {
    %c0_i32 = arith.constant 0 : i32
    %c0_i32_0 = arith.constant 0 : i32
    %c0_i32_1 = arith.constant 0 : i32
    return %c0_i32, %c0_i32_0 : i32, i32
  }
  func.func @transform_8(%arg0: i32) -> (i32, i32) {
    %c0_i32 = arith.constant 0 : i32
    %c0_i32_0 = arith.constant 0 : i32
    %c0_i32_1 = arith.constant 0 : i32
    return %c0_i32, %c0_i32_0 : i32, i32
  }
  func.func @transform_9(%arg0: i32) -> (i32, i32) {
    %c0_i32 = arith.constant 0 : i32
    %c0_i32_0 = arith.constant 0 : i32
    %c0_i32_1 = arith.constant 0 : i32
    return %c0_i32, %c0_i32_0 : i32, i32
  }
  func.func @transform_10(%arg0: i32) -> (i32, i32) {
    %c0_i32 = arith.constant 0 : i32
    %c0_i32_0 = arith.constant 0 : i32
    %c0_i32_1 = arith.constant 0 : i32
    return %c0_i32, %c0_i32_0 : i32, i32
  }
  func.func @transform_11(%arg0: i32) -> (i32, i32) {
    %c0_i32 = arith.constant 0 : i32
    %c0_i32_0 = arith.constant 0 : i32
    %c0_i32_1 = arith.constant 0 : i32
    return %c0_i32, %c0_i32_0 : i32, i32
  }
  func.func @transform_12(%arg0: i32) -> (i32, i32) {
    %c0_i32 = arith.constant 0 : i32
    %c0_i32_0 = arith.constant 0 : i32
    %c0_i32_1 = arith.constant 0 : i32
    return %c0_i32, %c0_i32_0 : i32, i32
  }
  func.func @transform_13(%arg0: i32) -> (i32, i32) {
    %c0_i32 = arith.constant 0 : i32
    %c0_i32_0 = arith.constant 0 : i32
    %c0_i32_1 = arith.constant 0 : i32
    return %c0_i32, %c0_i32_0 : i32, i32
  }
  func.func @transform_14(%arg0: i32) -> (i32, i32) {
    %c0_i32 = arith.constant 0 : i32
    %c0_i32_0 = arith.constant 0 : i32
    %c0_i32_1 = arith.constant 0 : i32
    return %c0_i32, %c0_i32_0 : i32, i32
  }
  func.func @transform_15(%arg0: i32) -> (i32, i32, i32) {
    %c0_i32 = arith.constant 0 : i32
    %c0_i32_0 = arith.constant 0 : i32
    %c0_i32_1 = arith.constant 0 : i32
    return %arg0, %c0_i32, %c0_i32_0 : i32, i32, i32
  }
}

module attributes {stable_mosaic.version = 11 : i64} {
  func.func @kernel(%arg0: i32, %arg1: memref<1x16x32xbf16, #tpu.memory_space<vmem>>, %arg2: memref<32x128xbf16, #tpu.memory_space<vmem>>, %arg3: memref<32x128xbf16, #tpu.memory_space<vmem>>, %arg4: memref<1x128xf32, #tpu.memory_space<vmem>>, %arg5: memref<32x32xbf16, #tpu.memory_space<vmem>>, %arg6: memref<1x32xf32, #tpu.memory_space<vmem>>, %arg7: memref<1x16x32xf32, #tpu.memory_space<vmem>>, %arg8: memref<16x128xf32, #tpu.memory_space<vmem>>, %arg9: memref<16x32xf32, #tpu.memory_space<vmem>>, %arg10: memref<2x32xf32, #tpu.memory_space<vmem>>, %arg11: memref<2x32xf32, #tpu.memory_space<vmem>>) attributes {dimension_semantics = [#tpu.dimension_semantics<parallel>], iteration_bounds = array<i64: 1>, scalar_prefetch = 0 : i64, scratch_operands = 4 : i64, tpu.core_type = #tpu.core_type<tc>, window_params = [{transform_indices = @transform_0, window_bounds = array<i64: 1, 16, 32>}, {pipeline_mode = #tpu.pipeline_mode<synchronous>, transform_indices = @transform_1, window_bounds = array<i64: 32, 128>}, {pipeline_mode = #tpu.pipeline_mode<synchronous>, transform_indices = @transform_2, window_bounds = array<i64: 32, 128>}, {pipeline_mode = #tpu.pipeline_mode<synchronous>, transform_indices = @transform_3, window_bounds = array<i64: 1, 128>}, {pipeline_mode = #tpu.pipeline_mode<synchronous>, transform_indices = @transform_4, window_bounds = array<i64: 32, 32>}, {pipeline_mode = #tpu.pipeline_mode<synchronous>, transform_indices = @transform_5, window_bounds = array<i64: 1, 32>}, {transform_indices = @transform_6, window_bounds = array<i64: 1, 16, 32>}]} {
    %c0 = arith.constant 0 : index
    %c0_0 = arith.constant 0 : index
    %c0_1 = arith.constant 0 : index
    %0 = vector.load %arg1[%c0, %c0_0, %c0_1] : memref<1x16x32xbf16, #tpu.memory_space<vmem>>, vector<1x16x32xbf16>
    %1 = vector.shape_cast %0 : vector<1x16x32xbf16> to vector<16x32xbf16>
    %c0_2 = arith.constant 0 : index
    %c0_3 = arith.constant 0 : index
    %2 = vector.load %arg2[%c0_2, %c0_3] : memref<32x128xbf16, #tpu.memory_space<vmem>>, vector<32x128xbf16>
    %cst = arith.constant dense<0.000000e+00> : vector<16x128xf32>
    %3 = tpu.matmul %1, %2, %cst {dimension_numbers = #tpu.dot_dimension_numbers<[1], [0], [0], [1], [0, 0, 1, 1], [], []>} : vector<16x32xbf16>, vector<32x128xbf16>, vector<16x128xf32> -> vector<16x128xf32>
    %c0_4 = arith.constant 0 : index
    %c0_5 = arith.constant 0 : index
    %4 = vector.load %arg4[%c0_4, %c0_5] : memref<1x128xf32, #tpu.memory_space<vmem>>, vector<1x128xf32>
    %5 = vector.broadcast %4 : vector<1x128xf32> to vector<16x128xf32>
    %6 = arith.addf %3, %5 : vector<16x128xf32>
    %c0_6 = arith.constant 0 : index
    %c0_7 = arith.constant 0 : index
    %7 = vector.load %arg8[%c0_6, %c0_7] : memref<16x128xf32, #tpu.memory_space<vmem>>, vector<16x128xf32>
    tpu.vector_store %arg8[%c0_6, %c0_7], %6 {strides = array<i32>} : memref<16x128xf32, #tpu.memory_space<vmem>>, vector<16x128xf32>,
    %cst_8 = arith.constant 0.000000e+00 : f32
    %8 = vector.broadcast %cst_8 : f32 to vector<2x32xf32>
    %c0_9 = arith.constant 0 : index
    %c0_10 = arith.constant 0 : index
    %9 = vector.load %arg10[%c0_9, %c0_10] : memref<2x32xf32, #tpu.memory_space<vmem>>, vector<2x32xf32>
    tpu.vector_store %arg10[%c0_9, %c0_10], %8 {strides = array<i32>} : memref<2x32xf32, #tpu.memory_space<vmem>>, vector<2x32xf32>,
    %cst_11 = arith.constant 0.000000e+00 : f32
    %10 = vector.broadcast %cst_11 : f32 to vector<2x32xf32>
    %c0_12 = arith.constant 0 : index
    %c0_13 = arith.constant 0 : index
    %11 = vector.load %arg11[%c0_12, %c0_13] : memref<2x32xf32, #tpu.memory_space<vmem>>, vector<2x32xf32>
    tpu.vector_store %arg11[%c0_12, %c0_13], %10 {strides = array<i32>} : memref<2x32xf32, #tpu.memory_space<vmem>>, vector<2x32xf32>,
    %c0_i32 = arith.constant 0 : i32
    %c2_i32 = arith.constant 2 : i32
    %12 = arith.muli %c0_i32, %c2_i32 : i32
    %13 = arith.index_cast %12 : i32 to index
    %c0_14 = arith.constant 0 : index
    %14 = vector.load %arg8[%13, %c0_14] : memref<16x128xf32, #tpu.memory_space<vmem>>, vector<2x128xf32>
    %c0_15 = arith.constant 0 : index
    %c0_16 = arith.constant 0 : index
    %15 = vector.load %arg10[%c0_15, %c0_16] : memref<2x32xf32, #tpu.memory_space<vmem>>, vector<2x32xf32>
    %16 = arith.truncf %15 : vector<2x32xf32> to vector<2x32xbf16>
    %c0_17 = arith.constant 0 : index
    %c0_18 = arith.constant 0 : index
    %17 = vector.load %arg3[%c0_17, %c0_18] : memref<32x128xbf16, #tpu.memory_space<vmem>>, vector<32x128xbf16>
    %cst_19 = arith.constant dense<0.000000e+00> : vector<2x128xf32>
    %18 = tpu.matmul %16, %17, %cst_19 {dimension_numbers = #tpu.dot_dimension_numbers<[1], [0], [0], [1], [0, 0, 1, 1], [], []>} : vector<2x32xbf16>, vector<32x128xbf16>, vector<2x128xf32> -> vector<2x128xf32>
    %19 = arith.addf %14, %18 : vector<2x128xf32>
    %20 = vector.extract_strided_slice %19 {offsets = [0, 0], sizes = [2, 32], strides = [1, 1]} : vector<2x128xf32> to vector<2x32xf32>
    %21 = arith.negf %20 : vector<2x32xf32>
    %22 = math.exp %21 : vector<2x32xf32>
    %cst_20 = arith.constant 1.000000e+00 : f32
    %23 = vector.broadcast %cst_20 : f32 to vector<2x32xf32>
    %24 = arith.addf %23, %22 : vector<2x32xf32>
    %25 = arith.divf %23, %24 : vector<2x32xf32>
    %26 = vector.extract_strided_slice %19 {offsets = [0, 32], sizes = [2, 32], strides = [1, 1]} : vector<2x128xf32> to vector<2x32xf32>
    %27 = arith.negf %26 : vector<2x32xf32>
    %28 = math.exp %27 : vector<2x32xf32>
    %cst_21 = arith.constant 1.000000e+00 : f32
    %29 = vector.broadcast %cst_21 : f32 to vector<2x32xf32>
    %30 = arith.addf %29, %28 : vector<2x32xf32>
    %31 = arith.divf %29, %30 : vector<2x32xf32>
    %32 = vector.extract_strided_slice %19 {offsets = [0, 64], sizes = [2, 32], strides = [1, 1]} : vector<2x128xf32> to vector<2x32xf32>
    %33 = math.tanh %32 : vector<2x32xf32>
    %34 = vector.extract_strided_slice %19 {offsets = [0, 96], sizes = [2, 32], strides = [1, 1]} : vector<2x128xf32> to vector<2x32xf32>
    %35 = arith.negf %34 : vector<2x32xf32>
    %36 = math.exp %35 : vector<2x32xf32>
    %cst_22 = arith.constant 1.000000e+00 : f32
    %37 = vector.broadcast %cst_22 : f32 to vector<2x32xf32>
    %38 = arith.addf %37, %36 : vector<2x32xf32>
    %39 = arith.divf %37, %38 : vector<2x32xf32>
    %c0_23 = arith.constant 0 : index
    %c0_24 = arith.constant 0 : index
    %40 = vector.load %arg11[%c0_23, %c0_24] : memref<2x32xf32, #tpu.memory_space<vmem>>, vector<2x32xf32>
    %41 = arith.mulf %31, %40 : vector<2x32xf32>
    %42 = arith.mulf %25, %33 : vector<2x32xf32>
    %43 = arith.addf %41, %42 : vector<2x32xf32>
    %44 = math.tanh %43 : vector<2x32xf32>
    %45 = arith.mulf %39, %44 : vector<2x32xf32>
    %c0_25 = arith.constant 0 : index
    %c0_26 = arith.constant 0 : index
    %46 = vector.load %arg11[%c0_25, %c0_26] : memref<2x32xf32, #tpu.memory_space<vmem>>, vector<2x32xf32>
    tpu.vector_store %arg11[%c0_25, %c0_26], %43 {strides = array<i32>} : memref<2x32xf32, #tpu.memory_space<vmem>>, vector<2x32xf32>,
    %c0_27 = arith.constant 0 : index
    %c0_28 = arith.constant 0 : index
    %47 = vector.load %arg10[%c0_27, %c0_28] : memref<2x32xf32, #tpu.memory_space<vmem>>, vector<2x32xf32>
    tpu.vector_store %arg10[%c0_27, %c0_28], %45 {strides = array<i32>} : memref<2x32xf32, #tpu.memory_space<vmem>>, vector<2x32xf32>,
    %48 = arith.index_cast %12 : i32 to index
    %c0_29 = arith.constant 0 : index
    %49 = vector.load %arg9[%48, %c0_29] : memref<16x32xf32, #tpu.memory_space<vmem>>, vector<2x32xf32>
    tpu.vector_store %arg9[%48, %c0_29], %45 {strides = array<i32>} : memref<16x32xf32, #tpu.memory_space<vmem>>, vector<2x32xf32>,
    %c1_i32 = arith.constant 1 : i32
    %c2_i32_30 = arith.constant 2 : i32
    %50 = arith.muli %c1_i32, %c2_i32_30 : i32
    %51 = arith.index_cast %50 : i32 to index
    %c0_31 = arith.constant 0 : index
    %52 = vector.load %arg8[%51, %c0_31] : memref<16x128xf32, #tpu.memory_space<vmem>>, vector<2x128xf32>
    %c0_32 = arith.constant 0 : index
    %c0_33 = arith.constant 0 : index
    %53 = vector.load %arg10[%c0_32, %c0_33] : memref<2x32xf32, #tpu.memory_space<vmem>>, vector<2x32xf32>
    %54 = arith.truncf %53 : vector<2x32xf32> to vector<2x32xbf16>
    %c0_34 = arith.constant 0 : index
    %c0_35 = arith.constant 0 : index
    %55 = vector.load %arg3[%c0_34, %c0_35] : memref<32x128xbf16, #tpu.memory_space<vmem>>, vector<32x128xbf16>
    %cst_36 = arith.constant dense<0.000000e+00> : vector<2x128xf32>
    %56 = tpu.matmul %54, %55, %cst_36 {dimension_numbers = #tpu.dot_dimension_numbers<[1], [0], [0], [1], [0, 0, 1, 1], [], []>} : vector<2x32xbf16>, vector<32x128xbf16>, vector<2x128xf32> -> vector<2x128xf32>
    %57 = arith.addf %52, %56 : vector<2x128xf32>
    %58 = vector.extract_strided_slice %57 {offsets = [0, 0], sizes = [2, 32], strides = [1, 1]} : vector<2x128xf32> to vector<2x32xf32>
    %59 = arith.negf %58 : vector<2x32xf32>
    %60 = math.exp %59 : vector<2x32xf32>
    %cst_37 = arith.constant 1.000000e+00 : f32
    %61 = vector.broadcast %cst_37 : f32 to vector<2x32xf32>
    %62 = arith.addf %61, %60 : vector<2x32xf32>
    %63 = arith.divf %61, %62 : vector<2x32xf32>
    %64 = vector.extract_strided_slice %57 {offsets = [0, 32], sizes = [2, 32], strides = [1, 1]} : vector<2x128xf32> to vector<2x32xf32>
    %65 = arith.negf %64 : vector<2x32xf32>
    %66 = math.exp %65 : vector<2x32xf32>
    %cst_38 = arith.constant 1.000000e+00 : f32
    %67 = vector.broadcast %cst_38 : f32 to vector<2x32xf32>
    %68 = arith.addf %67, %66 : vector<2x32xf32>
    %69 = arith.divf %67, %68 : vector<2x32xf32>
    %70 = vector.extract_strided_slice %57 {offsets = [0, 64], sizes = [2, 32], strides = [1, 1]} : vector<2x128xf32> to vector<2x32xf32>
    %71 = math.tanh %70 : vector<2x32xf32>
    %72 = vector.extract_strided_slice %57 {offsets = [0, 96], sizes = [2, 32], strides = [1, 1]} : vector<2x128xf32> to vector<2x32xf32>
    %73 = arith.negf %72 : vector<2x32xf32>
    %74 = math.exp %73 : vector<2x32xf32>
    %cst_39 = arith.constant 1.000000e+00 : f32
    %75 = vector.broadcast %cst_39 : f32 to vector<2x32xf32>
    %76 = arith.addf %75, %74 : vector<2x32xf32>
    %77 = arith.divf %75, %76 : vector<2x32xf32>
    %c0_40 = arith.constant 0 : index
    %c0_41 = arith.constant 0 : index
    %78 = vector.load %arg11[%c0_40, %c0_41] : memref<2x32xf32, #tpu.memory_space<vmem>>, vector<2x32xf32>
    %79 = arith.mulf %69, %78 : vector<2x32xf32>
    %80 = arith.mulf %63, %71 : vector<2x32xf32>
    %81 = arith.addf %79, %80 : vector<2x32xf32>
    %82 = math.tanh %81 : vector<2x32xf32>
    %83 = arith.mulf %77, %82 : vector<2x32xf32>
    %c0_42 = arith.constant 0 : index
    %c0_43 = arith.constant 0 : index
    %84 = vector.load %arg11[%c0_42, %c0_43] : memref<2x32xf32, #tpu.memory_space<vmem>>, vector<2x32xf32>
    tpu.vector_store %arg11[%c0_42, %c0_43], %81 {strides = array<i32>} : memref<2x32xf32, #tpu.memory_space<vmem>>, vector<2x32xf32>,
    %c0_44 = arith.constant 0 : index
    %c0_45 = arith.constant 0 : index
    %85 = vector.load %arg10[%c0_44, %c0_45] : memref<2x32xf32, #tpu.memory_space<vmem>>, vector<2x32xf32>
    tpu.vector_store %arg10[%c0_44, %c0_45], %83 {strides = array<i32>} : memref<2x32xf32, #tpu.memory_space<vmem>>, vector<2x32xf32>,
    %86 = arith.index_cast %50 : i32 to index
    %c0_46 = arith.constant 0 : index
    %87 = vector.load %arg9[%86, %c0_46] : memref<16x32xf32, #tpu.memory_space<vmem>>, vector<2x32xf32>
    tpu.vector_store %arg9[%86, %c0_46], %83 {strides = array<i32>} : memref<16x32xf32, #tpu.memory_space<vmem>>, vector<2x32xf32>,
    %c2_i32_47 = arith.constant 2 : i32
    %c2_i32_48 = arith.constant 2 : i32
    %88 = arith.muli %c2_i32_47, %c2_i32_48 : i32
    %89 = arith.index_cast %88 : i32 to index
    %c0_49 = arith.constant 0 : index
    %90 = vector.load %arg8[%89, %c0_49] : memref<16x128xf32, #tpu.memory_space<vmem>>, vector<2x128xf32>
    %c0_50 = arith.constant 0 : index
    %c0_51 = arith.constant 0 : index
    %91 = vector.load %arg10[%c0_50, %c0_51] : memref<2x32xf32, #tpu.memory_space<vmem>>, vector<2x32xf32>
    %92 = arith.truncf %91 : vector<2x32xf32> to vector<2x32xbf16>
    %c0_52 = arith.constant 0 : index
    %c0_53 = arith.constant 0 : index
    %93 = vector.load %arg3[%c0_52, %c0_53] : memref<32x128xbf16, #tpu.memory_space<vmem>>, vector<32x128xbf16>
    %cst_54 = arith.constant dense<0.000000e+00> : vector<2x128xf32>
    %94 = tpu.matmul %92, %93, %cst_54 {dimension_numbers = #tpu.dot_dimension_numbers<[1], [0], [0], [1], [0, 0, 1, 1], [], []>} : vector<2x32xbf16>, vector<32x128xbf16>, vector<2x128xf32> -> vector<2x128xf32>
    %95 = arith.addf %90, %94 : vector<2x128xf32>
    %96 = vector.extract_strided_slice %95 {offsets = [0, 0], sizes = [2, 32], strides = [1, 1]} : vector<2x128xf32> to vector<2x32xf32>
    %97 = arith.negf %96 : vector<2x32xf32>
    %98 = math.exp %97 : vector<2x32xf32>
    %cst_55 = arith.constant 1.000000e+00 : f32
    %99 = vector.broadcast %cst_55 : f32 to vector<2x32xf32>
    %100 = arith.addf %99, %98 : vector<2x32xf32>
    %101 = arith.divf %99, %100 : vector<2x32xf32>
    %102 = vector.extract_strided_slice %95 {offsets = [0, 32], sizes = [2, 32], strides = [1, 1]} : vector<2x128xf32> to vector<2x32xf32>
    %103 = arith.negf %102 : vector<2x32xf32>
    %104 = math.exp %103 : vector<2x32xf32>
    %cst_56 = arith.constant 1.000000e+00 : f32
    %105 = vector.broadcast %cst_56 : f32 to vector<2x32xf32>
    %106 = arith.addf %105, %104 : vector<2x32xf32>
    %107 = arith.divf %105, %106 : vector<2x32xf32>
    %108 = vector.extract_strided_slice %95 {offsets = [0, 64], sizes = [2, 32], strides = [1, 1]} : vector<2x128xf32> to vector<2x32xf32>
    %109 = math.tanh %108 : vector<2x32xf32>
    %110 = vector.extract_strided_slice %95 {offsets = [0, 96], sizes = [2, 32], strides = [1, 1]} : vector<2x128xf32> to vector<2x32xf32>
    %111 = arith.negf %110 : vector<2x32xf32>
    %112 = math.exp %111 : vector<2x32xf32>
    %cst_57 = arith.constant 1.000000e+00 : f32
    %113 = vector.broadcast %cst_57 : f32 to vector<2x32xf32>
    %114 = arith.addf %113, %112 : vector<2x32xf32>
    %115 = arith.divf %113, %114 : vector<2x32xf32>
    %c0_58 = arith.constant 0 : index
    %c0_59 = arith.constant 0 : index
    %116 = vector.load %arg11[%c0_58, %c0_59] : memref<2x32xf32, #tpu.memory_space<vmem>>, vector<2x32xf32>
    %117 = arith.mulf %107, %116 : vector<2x32xf32>
    %118 = arith.mulf %101, %109 : vector<2x32xf32>
    %119 = arith.addf %117, %118 : vector<2x32xf32>
    %120 = math.tanh %119 : vector<2x32xf32>
    %121 = arith.mulf %115, %120 : vector<2x32xf32>
    %c0_60 = arith.constant 0 : index
    %c0_61 = arith.constant 0 : index
    %122 = vector.load %arg11[%c0_60, %c0_61] : memref<2x32xf32, #tpu.memory_space<vmem>>, vector<2x32xf32>
    tpu.vector_store %arg11[%c0_60, %c0_61], %119 {strides = array<i32>} : memref<2x32xf32, #tpu.memory_space<vmem>>, vector<2x32xf32>,
    %c0_62 = arith.constant 0 : index
    %c0_63 = arith.constant 0 : index
    %123 = vector.load %arg10[%c0_62, %c0_63] : memref<2x32xf32, #tpu.memory_space<vmem>>, vector<2x32xf32>
    tpu.vector_store %arg10[%c0_62, %c0_63], %121 {strides = array<i32>} : memref<2x32xf32, #tpu.memory_space<vmem>>, vector<2x32xf32>,
    %124 = arith.index_cast %88 : i32 to index
    %c0_64 = arith.constant 0 : index
    %125 = vector.load %arg9[%124, %c0_64] : memref<16x32xf32, #tpu.memory_space<vmem>>, vector<2x32xf32>
    tpu.vector_store %arg9[%124, %c0_64], %121 {strides = array<i32>} : memref<16x32xf32, #tpu.memory_space<vmem>>, vector<2x32xf32>,
    %c3_i32 = arith.constant 3 : i32
    %c2_i32_65 = arith.constant 2 : i32
    %126 = arith.muli %c3_i32, %c2_i32_65 : i32
    %127 = arith.index_cast %126 : i32 to index
    %c0_66 = arith.constant 0 : index
    %128 = vector.load %arg8[%127, %c0_66] : memref<16x128xf32, #tpu.memory_space<vmem>>, vector<2x128xf32>
    %c0_67 = arith.constant 0 : index
    %c0_68 = arith.constant 0 : index
    %129 = vector.load %arg10[%c0_67, %c0_68] : memref<2x32xf32, #tpu.memory_space<vmem>>, vector<2x32xf32>
    %130 = arith.truncf %129 : vector<2x32xf32> to vector<2x32xbf16>
    %c0_69 = arith.constant 0 : index
    %c0_70 = arith.constant 0 : index
    %131 = vector.load %arg3[%c0_69, %c0_70] : memref<32x128xbf16, #tpu.memory_space<vmem>>, vector<32x128xbf16>
    %cst_71 = arith.constant dense<0.000000e+00> : vector<2x128xf32>
    %132 = tpu.matmul %130, %131, %cst_71 {dimension_numbers = #tpu.dot_dimension_numbers<[1], [0], [0], [1], [0, 0, 1, 1], [], []>} : vector<2x32xbf16>, vector<32x128xbf16>, vector<2x128xf32> -> vector<2x128xf32>
    %133 = arith.addf %128, %132 : vector<2x128xf32>
    %134 = vector.extract_strided_slice %133 {offsets = [0, 0], sizes = [2, 32], strides = [1, 1]} : vector<2x128xf32> to vector<2x32xf32>
    %135 = arith.negf %134 : vector<2x32xf32>
    %136 = math.exp %135 : vector<2x32xf32>
    %cst_72 = arith.constant 1.000000e+00 : f32
    %137 = vector.broadcast %cst_72 : f32 to vector<2x32xf32>
    %138 = arith.addf %137, %136 : vector<2x32xf32>
    %139 = arith.divf %137, %138 : vector<2x32xf32>
    %140 = vector.extract_strided_slice %133 {offsets = [0, 32], sizes = [2, 32], strides = [1, 1]} : vector<2x128xf32> to vector<2x32xf32>
    %141 = arith.negf %140 : vector<2x32xf32>
    %142 = math.exp %141 : vector<2x32xf32>
    %cst_73 = arith.constant 1.000000e+00 : f32
    %143 = vector.broadcast %cst_73 : f32 to vector<2x32xf32>
    %144 = arith.addf %143, %142 : vector<2x32xf32>
    %145 = arith.divf %143, %144 : vector<2x32xf32>
    %146 = vector.extract_strided_slice %133 {offsets = [0, 64], sizes = [2, 32], strides = [1, 1]} : vector<2x128xf32> to vector<2x32xf32>
    %147 = math.tanh %146 : vector<2x32xf32>
    %148 = vector.extract_strided_slice %133 {offsets = [0, 96], sizes = [2, 32], strides = [1, 1]} : vector<2x128xf32> to vector<2x32xf32>
    %149 = arith.negf %148 : vector<2x32xf32>
    %150 = math.exp %149 : vector<2x32xf32>
    %cst_74 = arith.constant 1.000000e+00 : f32
    %151 = vector.broadcast %cst_74 : f32 to vector<2x32xf32>
    %152 = arith.addf %151, %150 : vector<2x32xf32>
    %153 = arith.divf %151, %152 : vector<2x32xf32>
    %c0_75 = arith.constant 0 : index
    %c0_76 = arith.constant 0 : index
    %154 = vector.load %arg11[%c0_75, %c0_76] : memref<2x32xf32, #tpu.memory_space<vmem>>, vector<2x32xf32>
    %155 = arith.mulf %145, %154 : vector<2x32xf32>
    %156 = arith.mulf %139, %147 : vector<2x32xf32>
    %157 = arith.addf %155, %156 : vector<2x32xf32>
    %158 = math.tanh %157 : vector<2x32xf32>
    %159 = arith.mulf %153, %158 : vector<2x32xf32>
    %c0_77 = arith.constant 0 : index
    %c0_78 = arith.constant 0 : index
    %160 = vector.load %arg11[%c0_77, %c0_78] : memref<2x32xf32, #tpu.memory_space<vmem>>, vector<2x32xf32>
    tpu.vector_store %arg11[%c0_77, %c0_78], %157 {strides = array<i32>} : memref<2x32xf32, #tpu.memory_space<vmem>>, vector<2x32xf32>,
    %c0_79 = arith.constant 0 : index
    %c0_80 = arith.constant 0 : index
    %161 = vector.load %arg10[%c0_79, %c0_80] : memref<2x32xf32, #tpu.memory_space<vmem>>, vector<2x32xf32>
    tpu.vector_store %arg10[%c0_79, %c0_80], %159 {strides = array<i32>} : memref<2x32xf32, #tpu.memory_space<vmem>>, vector<2x32xf32>,
    %162 = arith.index_cast %126 : i32 to index
    %c0_81 = arith.constant 0 : index
    %163 = vector.load %arg9[%162, %c0_81] : memref<16x32xf32, #tpu.memory_space<vmem>>, vector<2x32xf32>
    tpu.vector_store %arg9[%162, %c0_81], %159 {strides = array<i32>} : memref<16x32xf32, #tpu.memory_space<vmem>>, vector<2x32xf32>,
    %c4_i32 = arith.constant 4 : i32
    %c2_i32_82 = arith.constant 2 : i32
    %164 = arith.muli %c4_i32, %c2_i32_82 : i32
    %165 = arith.index_cast %164 : i32 to index
    %c0_83 = arith.constant 0 : index
    %166 = vector.load %arg8[%165, %c0_83] : memref<16x128xf32, #tpu.memory_space<vmem>>, vector<2x128xf32>
    %c0_84 = arith.constant 0 : index
    %c0_85 = arith.constant 0 : index
    %167 = vector.load %arg10[%c0_84, %c0_85] : memref<2x32xf32, #tpu.memory_space<vmem>>, vector<2x32xf32>
    %168 = arith.truncf %167 : vector<2x32xf32> to vector<2x32xbf16>
    %c0_86 = arith.constant 0 : index
    %c0_87 = arith.constant 0 : index
    %169 = vector.load %arg3[%c0_86, %c0_87] : memref<32x128xbf16, #tpu.memory_space<vmem>>, vector<32x128xbf16>
    %cst_88 = arith.constant dense<0.000000e+00> : vector<2x128xf32>
    %170 = tpu.matmul %168, %169, %cst_88 {dimension_numbers = #tpu.dot_dimension_numbers<[1], [0], [0], [1], [0, 0, 1, 1], [], []>} : vector<2x32xbf16>, vector<32x128xbf16>, vector<2x128xf32> -> vector<2x128xf32>
    %171 = arith.addf %166, %170 : vector<2x128xf32>
    %172 = vector.extract_strided_slice %171 {offsets = [0, 0], sizes = [2, 32], strides = [1, 1]} : vector<2x128xf32> to vector<2x32xf32>
    %173 = arith.negf %172 : vector<2x32xf32>
    %174 = math.exp %173 : vector<2x32xf32>
    %cst_89 = arith.constant 1.000000e+00 : f32
    %175 = vector.broadcast %cst_89 : f32 to vector<2x32xf32>
    %176 = arith.addf %175, %174 : vector<2x32xf32>
    %177 = arith.divf %175, %176 : vector<2x32xf32>
    %178 = vector.extract_strided_slice %171 {offsets = [0, 32], sizes = [2, 32], strides = [1, 1]} : vector<2x128xf32> to vector<2x32xf32>
    %179 = arith.negf %178 : vector<2x32xf32>
    %180 = math.exp %179 : vector<2x32xf32>
    %cst_90 = arith.constant 1.000000e+00 : f32
    %181 = vector.broadcast %cst_90 : f32 to vector<2x32xf32>
    %182 = arith.addf %181, %180 : vector<2x32xf32>
    %183 = arith.divf %181, %182 : vector<2x32xf32>
    %184 = vector.extract_strided_slice %171 {offsets = [0, 64], sizes = [2, 32], strides = [1, 1]} : vector<2x128xf32> to vector<2x32xf32>
    %185 = math.tanh %184 : vector<2x32xf32>
    %186 = vector.extract_strided_slice %171 {offsets = [0, 96], sizes = [2, 32], strides = [1, 1]} : vector<2x128xf32> to vector<2x32xf32>
    %187 = arith.negf %186 : vector<2x32xf32>
    %188 = math.exp %187 : vector<2x32xf32>
    %cst_91 = arith.constant 1.000000e+00 : f32
    %189 = vector.broadcast %cst_91 : f32 to vector<2x32xf32>
    %190 = arith.addf %189, %188 : vector<2x32xf32>
    %191 = arith.divf %189, %190 : vector<2x32xf32>
    %c0_92 = arith.constant 0 : index
    %c0_93 = arith.constant 0 : index
    %192 = vector.load %arg11[%c0_92, %c0_93] : memref<2x32xf32, #tpu.memory_space<vmem>>, vector<2x32xf32>
    %193 = arith.mulf %183, %192 : vector<2x32xf32>
    %194 = arith.mulf %177, %185 : vector<2x32xf32>
    %195 = arith.addf %193, %194 : vector<2x32xf32>
    %196 = math.tanh %195 : vector<2x32xf32>
    %197 = arith.mulf %191, %196 : vector<2x32xf32>
    %c0_94 = arith.constant 0 : index
    %c0_95 = arith.constant 0 : index
    %198 = vector.load %arg11[%c0_94, %c0_95] : memref<2x32xf32, #tpu.memory_space<vmem>>, vector<2x32xf32>
    tpu.vector_store %arg11[%c0_94, %c0_95], %195 {strides = array<i32>} : memref<2x32xf32, #tpu.memory_space<vmem>>, vector<2x32xf32>,
    %c0_96 = arith.constant 0 : index
    %c0_97 = arith.constant 0 : index
    %199 = vector.load %arg10[%c0_96, %c0_97] : memref<2x32xf32, #tpu.memory_space<vmem>>, vector<2x32xf32>
    tpu.vector_store %arg10[%c0_96, %c0_97], %197 {strides = array<i32>} : memref<2x32xf32, #tpu.memory_space<vmem>>, vector<2x32xf32>,
    %200 = arith.index_cast %164 : i32 to index
    %c0_98 = arith.constant 0 : index
    %201 = vector.load %arg9[%200, %c0_98] : memref<16x32xf32, #tpu.memory_space<vmem>>, vector<2x32xf32>
    tpu.vector_store %arg9[%200, %c0_98], %197 {strides = array<i32>} : memref<16x32xf32, #tpu.memory_space<vmem>>, vector<2x32xf32>,
    %c5_i32 = arith.constant 5 : i32
    %c2_i32_99 = arith.constant 2 : i32
    %202 = arith.muli %c5_i32, %c2_i32_99 : i32
    %203 = arith.index_cast %202 : i32 to index
    %c0_100 = arith.constant 0 : index
    %204 = vector.load %arg8[%203, %c0_100] : memref<16x128xf32, #tpu.memory_space<vmem>>, vector<2x128xf32>
    %c0_101 = arith.constant 0 : index
    %c0_102 = arith.constant 0 : index
    %205 = vector.load %arg10[%c0_101, %c0_102] : memref<2x32xf32, #tpu.memory_space<vmem>>, vector<2x32xf32>
    %206 = arith.truncf %205 : vector<2x32xf32> to vector<2x32xbf16>
    %c0_103 = arith.constant 0 : index
    %c0_104 = arith.constant 0 : index
    %207 = vector.load %arg3[%c0_103, %c0_104] : memref<32x128xbf16, #tpu.memory_space<vmem>>, vector<32x128xbf16>
    %cst_105 = arith.constant dense<0.000000e+00> : vector<2x128xf32>
    %208 = tpu.matmul %206, %207, %cst_105 {dimension_numbers = #tpu.dot_dimension_numbers<[1], [0], [0], [1], [0, 0, 1, 1], [], []>} : vector<2x32xbf16>, vector<32x128xbf16>, vector<2x128xf32> -> vector<2x128xf32>
    %209 = arith.addf %204, %208 : vector<2x128xf32>
    %210 = vector.extract_strided_slice %209 {offsets = [0, 0], sizes = [2, 32], strides = [1, 1]} : vector<2x128xf32> to vector<2x32xf32>
    %211 = arith.negf %210 : vector<2x32xf32>
    %212 = math.exp %211 : vector<2x32xf32>
    %cst_106 = arith.constant 1.000000e+00 : f32
    %213 = vector.broadcast %cst_106 : f32 to vector<2x32xf32>
    %214 = arith.addf %213, %212 : vector<2x32xf32>
    %215 = arith.divf %213, %214 : vector<2x32xf32>
    %216 = vector.extract_strided_slice %209 {offsets = [0, 32], sizes = [2, 32], strides = [1, 1]} : vector<2x128xf32> to vector<2x32xf32>
    %217 = arith.negf %216 : vector<2x32xf32>
    %218 = math.exp %217 : vector<2x32xf32>
    %cst_107 = arith.constant 1.000000e+00 : f32
    %219 = vector.broadcast %cst_107 : f32 to vector<2x32xf32>
    %220 = arith.addf %219, %218 : vector<2x32xf32>
    %221 = arith.divf %219, %220 : vector<2x32xf32>
    %222 = vector.extract_strided_slice %209 {offsets = [0, 64], sizes = [2, 32], strides = [1, 1]} : vector<2x128xf32> to vector<2x32xf32>
    %223 = math.tanh %222 : vector<2x32xf32>
    %224 = vector.extract_strided_slice %209 {offsets = [0, 96], sizes = [2, 32], strides = [1, 1]} : vector<2x128xf32> to vector<2x32xf32>
    %225 = arith.negf %224 : vector<2x32xf32>
    %226 = math.exp %225 : vector<2x32xf32>
    %cst_108 = arith.constant 1.000000e+00 : f32
    %227 = vector.broadcast %cst_108 : f32 to vector<2x32xf32>
    %228 = arith.addf %227, %226 : vector<2x32xf32>
    %229 = arith.divf %227, %228 : vector<2x32xf32>
    %c0_109 = arith.constant 0 : index
    %c0_110 = arith.constant 0 : index
    %230 = vector.load %arg11[%c0_109, %c0_110] : memref<2x32xf32, #tpu.memory_space<vmem>>, vector<2x32xf32>
    %231 = arith.mulf %221, %230 : vector<2x32xf32>
    %232 = arith.mulf %215, %223 : vector<2x32xf32>
    %233 = arith.addf %231, %232 : vector<2x32xf32>
    %234 = math.tanh %233 : vector<2x32xf32>
    %235 = arith.mulf %229, %234 : vector<2x32xf32>
    %c0_111 = arith.constant 0 : index
    %c0_112 = arith.constant 0 : index
    %236 = vector.load %arg11[%c0_111, %c0_112] : memref<2x32xf32, #tpu.memory_space<vmem>>, vector<2x32xf32>
    tpu.vector_store %arg11[%c0_111, %c0_112], %233 {strides = array<i32>} : memref<2x32xf32, #tpu.memory_space<vmem>>, vector<2x32xf32>,
    %c0_113 = arith.constant 0 : index
    %c0_114 = arith.constant 0 : index
    %237 = vector.load %arg10[%c0_113, %c0_114] : memref<2x32xf32, #tpu.memory_space<vmem>>, vector<2x32xf32>
    tpu.vector_store %arg10[%c0_113, %c0_114], %235 {strides = array<i32>} : memref<2x32xf32, #tpu.memory_space<vmem>>, vector<2x32xf32>,
    %238 = arith.index_cast %202 : i32 to index
    %c0_115 = arith.constant 0 : index
    %239 = vector.load %arg9[%238, %c0_115] : memref<16x32xf32, #tpu.memory_space<vmem>>, vector<2x32xf32>
    tpu.vector_store %arg9[%238, %c0_115], %235 {strides = array<i32>} : memref<16x32xf32, #tpu.memory_space<vmem>>, vector<2x32xf32>,
    %c6_i32 = arith.constant 6 : i32
    %c2_i32_116 = arith.constant 2 : i32
    %240 = arith.muli %c6_i32, %c2_i32_116 : i32
    %241 = arith.index_cast %240 : i32 to index
    %c0_117 = arith.constant 0 : index
    %242 = vector.load %arg8[%241, %c0_117] : memref<16x128xf32, #tpu.memory_space<vmem>>, vector<2x128xf32>
    %c0_118 = arith.constant 0 : index
    %c0_119 = arith.constant 0 : index
    %243 = vector.load %arg10[%c0_118, %c0_119] : memref<2x32xf32, #tpu.memory_space<vmem>>, vector<2x32xf32>
    %244 = arith.truncf %243 : vector<2x32xf32> to vector<2x32xbf16>
    %c0_120 = arith.constant 0 : index
    %c0_121 = arith.constant 0 : index
    %245 = vector.load %arg3[%c0_120, %c0_121] : memref<32x128xbf16, #tpu.memory_space<vmem>>, vector<32x128xbf16>
    %cst_122 = arith.constant dense<0.000000e+00> : vector<2x128xf32>
    %246 = tpu.matmul %244, %245, %cst_122 {dimension_numbers = #tpu.dot_dimension_numbers<[1], [0], [0], [1], [0, 0, 1, 1], [], []>} : vector<2x32xbf16>, vector<32x128xbf16>, vector<2x128xf32> -> vector<2x128xf32>
    %247 = arith.addf %242, %246 : vector<2x128xf32>
    %248 = vector.extract_strided_slice %247 {offsets = [0, 0], sizes = [2, 32], strides = [1, 1]} : vector<2x128xf32> to vector<2x32xf32>
    %249 = arith.negf %248 : vector<2x32xf32>
    %250 = math.exp %249 : vector<2x32xf32>
    %cst_123 = arith.constant 1.000000e+00 : f32
    %251 = vector.broadcast %cst_123 : f32 to vector<2x32xf32>
    %252 = arith.addf %251, %250 : vector<2x32xf32>
    %253 = arith.divf %251, %252 : vector<2x32xf32>
    %254 = vector.extract_strided_slice %247 {offsets = [0, 32], sizes = [2, 32], strides = [1, 1]} : vector<2x128xf32> to vector<2x32xf32>
    %255 = arith.negf %254 : vector<2x32xf32>
    %256 = math.exp %255 : vector<2x32xf32>
    %cst_124 = arith.constant 1.000000e+00 : f32
    %257 = vector.broadcast %cst_124 : f32 to vector<2x32xf32>
    %258 = arith.addf %257, %256 : vector<2x32xf32>
    %259 = arith.divf %257, %258 : vector<2x32xf32>
    %260 = vector.extract_strided_slice %247 {offsets = [0, 64], sizes = [2, 32], strides = [1, 1]} : vector<2x128xf32> to vector<2x32xf32>
    %261 = math.tanh %260 : vector<2x32xf32>
    %262 = vector.extract_strided_slice %247 {offsets = [0, 96], sizes = [2, 32], strides = [1, 1]} : vector<2x128xf32> to vector<2x32xf32>
    %263 = arith.negf %262 : vector<2x32xf32>
    %264 = math.exp %263 : vector<2x32xf32>
    %cst_125 = arith.constant 1.000000e+00 : f32
    %265 = vector.broadcast %cst_125 : f32 to vector<2x32xf32>
    %266 = arith.addf %265, %264 : vector<2x32xf32>
    %267 = arith.divf %265, %266 : vector<2x32xf32>
    %c0_126 = arith.constant 0 : index
    %c0_127 = arith.constant 0 : index
    %268 = vector.load %arg11[%c0_126, %c0_127] : memref<2x32xf32, #tpu.memory_space<vmem>>, vector<2x32xf32>
    %269 = arith.mulf %259, %268 : vector<2x32xf32>
    %270 = arith.mulf %253, %261 : vector<2x32xf32>
    %271 = arith.addf %269, %270 : vector<2x32xf32>
    %272 = math.tanh %271 : vector<2x32xf32>
    %273 = arith.mulf %267, %272 : vector<2x32xf32>
    %c0_128 = arith.constant 0 : index
    %c0_129 = arith.constant 0 : index
    %274 = vector.load %arg11[%c0_128, %c0_129] : memref<2x32xf32, #tpu.memory_space<vmem>>, vector<2x32xf32>
    tpu.vector_store %arg11[%c0_128, %c0_129], %271 {strides = array<i32>} : memref<2x32xf32, #tpu.memory_space<vmem>>, vector<2x32xf32>,
    %c0_130 = arith.constant 0 : index
    %c0_131 = arith.constant 0 : index
    %275 = vector.load %arg10[%c0_130, %c0_131] : memref<2x32xf32, #tpu.memory_space<vmem>>, vector<2x32xf32>
    tpu.vector_store %arg10[%c0_130, %c0_131], %273 {strides = array<i32>} : memref<2x32xf32, #tpu.memory_space<vmem>>, vector<2x32xf32>,
    %276 = arith.index_cast %240 : i32 to index
    %c0_132 = arith.constant 0 : index
    %277 = vector.load %arg9[%276, %c0_132] : memref<16x32xf32, #tpu.memory_space<vmem>>, vector<2x32xf32>
    tpu.vector_store %arg9[%276, %c0_132], %273 {strides = array<i32>} : memref<16x32xf32, #tpu.memory_space<vmem>>, vector<2x32xf32>,
    %c7_i32 = arith.constant 7 : i32
    %c2_i32_133 = arith.constant 2 : i32
    %278 = arith.muli %c7_i32, %c2_i32_133 : i32
    %279 = arith.index_cast %278 : i32 to index
    %c0_134 = arith.constant 0 : index
    %280 = vector.load %arg8[%279, %c0_134] : memref<16x128xf32, #tpu.memory_space<vmem>>, vector<2x128xf32>
    %c0_135 = arith.constant 0 : index
    %c0_136 = arith.constant 0 : index
    %281 = vector.load %arg10[%c0_135, %c0_136] : memref<2x32xf32, #tpu.memory_space<vmem>>, vector<2x32xf32>
    %282 = arith.truncf %281 : vector<2x32xf32> to vector<2x32xbf16>
    %c0_137 = arith.constant 0 : index
    %c0_138 = arith.constant 0 : index
    %283 = vector.load %arg3[%c0_137, %c0_138] : memref<32x128xbf16, #tpu.memory_space<vmem>>, vector<32x128xbf16>
    %cst_139 = arith.constant dense<0.000000e+00> : vector<2x128xf32>
    %284 = tpu.matmul %282, %283, %cst_139 {dimension_numbers = #tpu.dot_dimension_numbers<[1], [0], [0], [1], [0, 0, 1, 1], [], []>} : vector<2x32xbf16>, vector<32x128xbf16>, vector<2x128xf32> -> vector<2x128xf32>
    %285 = arith.addf %280, %284 : vector<2x128xf32>
    %286 = vector.extract_strided_slice %285 {offsets = [0, 0], sizes = [2, 32], strides = [1, 1]} : vector<2x128xf32> to vector<2x32xf32>
    %287 = arith.negf %286 : vector<2x32xf32>
    %288 = math.exp %287 : vector<2x32xf32>
    %cst_140 = arith.constant 1.000000e+00 : f32
    %289 = vector.broadcast %cst_140 : f32 to vector<2x32xf32>
    %290 = arith.addf %289, %288 : vector<2x32xf32>
    %291 = arith.divf %289, %290 : vector<2x32xf32>
    %292 = vector.extract_strided_slice %285 {offsets = [0, 32], sizes = [2, 32], strides = [1, 1]} : vector<2x128xf32> to vector<2x32xf32>
    %293 = arith.negf %292 : vector<2x32xf32>
    %294 = math.exp %293 : vector<2x32xf32>
    %cst_141 = arith.constant 1.000000e+00 : f32
    %295 = vector.broadcast %cst_141 : f32 to vector<2x32xf32>
    %296 = arith.addf %295, %294 : vector<2x32xf32>
    %297 = arith.divf %295, %296 : vector<2x32xf32>
    %298 = vector.extract_strided_slice %285 {offsets = [0, 64], sizes = [2, 32], strides = [1, 1]} : vector<2x128xf32> to vector<2x32xf32>
    %299 = math.tanh %298 : vector<2x32xf32>
    %300 = vector.extract_strided_slice %285 {offsets = [0, 96], sizes = [2, 32], strides = [1, 1]} : vector<2x128xf32> to vector<2x32xf32>
    %301 = arith.negf %300 : vector<2x32xf32>
    %302 = math.exp %301 : vector<2x32xf32>
    %cst_142 = arith.constant 1.000000e+00 : f32
    %303 = vector.broadcast %cst_142 : f32 to vector<2x32xf32>
    %304 = arith.addf %303, %302 : vector<2x32xf32>
    %305 = arith.divf %303, %304 : vector<2x32xf32>
    %c0_143 = arith.constant 0 : index
    %c0_144 = arith.constant 0 : index
    %306 = vector.load %arg11[%c0_143, %c0_144] : memref<2x32xf32, #tpu.memory_space<vmem>>, vector<2x32xf32>
    %307 = arith.mulf %297, %306 : vector<2x32xf32>
    %308 = arith.mulf %291, %299 : vector<2x32xf32>
    %309 = arith.addf %307, %308 : vector<2x32xf32>
    %310 = math.tanh %309 : vector<2x32xf32>
    %311 = arith.mulf %305, %310 : vector<2x32xf32>
    %c0_145 = arith.constant 0 : index
    %c0_146 = arith.constant 0 : index
    %312 = vector.load %arg11[%c0_145, %c0_146] : memref<2x32xf32, #tpu.memory_space<vmem>>, vector<2x32xf32>
    tpu.vector_store %arg11[%c0_145, %c0_146], %309 {strides = array<i32>} : memref<2x32xf32, #tpu.memory_space<vmem>>, vector<2x32xf32>,
    %c0_147 = arith.constant 0 : index
    %c0_148 = arith.constant 0 : index
    %313 = vector.load %arg10[%c0_147, %c0_148] : memref<2x32xf32, #tpu.memory_space<vmem>>, vector<2x32xf32>
    tpu.vector_store %arg10[%c0_147, %c0_148], %311 {strides = array<i32>} : memref<2x32xf32, #tpu.memory_space<vmem>>, vector<2x32xf32>,
    %314 = arith.index_cast %278 : i32 to index
    %c0_149 = arith.constant 0 : index
    %315 = vector.load %arg9[%314, %c0_149] : memref<16x32xf32, #tpu.memory_space<vmem>>, vector<2x32xf32>
    tpu.vector_store %arg9[%314, %c0_149], %311 {strides = array<i32>} : memref<16x32xf32, #tpu.memory_space<vmem>>, vector<2x32xf32>,
    %c8_i32 = arith.constant 8 : i32
    %c0_150 = arith.constant 0 : index
    %c0_151 = arith.constant 0 : index
    %316 = vector.load %arg9[%c0_150, %c0_151] : memref<16x32xf32, #tpu.memory_space<vmem>>, vector<16x32xf32>
    %317 = arith.truncf %316 : vector<16x32xf32> to vector<16x32xbf16>
    %c0_152 = arith.constant 0 : index
    %c0_153 = arith.constant 0 : index
    %318 = vector.load %arg5[%c0_152, %c0_153] : memref<32x32xbf16, #tpu.memory_space<vmem>>, vector<32x32xbf16>
    %cst_154 = arith.constant dense<0.000000e+00> : vector<16x32xf32>
    %319 = tpu.matmul %317, %318, %cst_154 {dimension_numbers = #tpu.dot_dimension_numbers<[1], [0], [0], [1], [0, 0, 1, 1], [], []>} : vector<16x32xbf16>, vector<32x32xbf16>, vector<16x32xf32> -> vector<16x32xf32>
    %c0_155 = arith.constant 0 : index
    %c0_156 = arith.constant 0 : index
    %320 = vector.load %arg6[%c0_155, %c0_156] : memref<1x32xf32, #tpu.memory_space<vmem>>, vector<1x32xf32>
    %321 = vector.broadcast %320 : vector<1x32xf32> to vector<16x32xf32>
    %322 = arith.addf %319, %321 : vector<16x32xf32>
    %c0_157 = arith.constant 0 : index
    %c0_158 = arith.constant 0 : index
    %c0_159 = arith.constant 0 : index
    %323 = vector.load %arg7[%c0_157, %c0_158, %c0_159] : memref<1x16x32xf32, #tpu.memory_space<vmem>>, vector<1x16x32xf32>
    %324 = vector.shape_cast %323 : vector<1x16x32xf32> to vector<16x32xf32>
    %325 = vector.shape_cast %322 : vector<16x32xf32> to vector<1x16x32xf32>
    tpu.vector_store %arg7[%c0_157, %c0_158, %c0_159], %325 {strides = array<i32>} : memref<1x16x32xf32, #tpu.memory_space<vmem>>, vector<1x16x32xf32>,
    return
  }
  func.func @transform_0(%arg0: i32) -> (i32, i32, i32) {
    %c0_i32 = arith.constant 0 : i32
    %c0_i32_0 = arith.constant 0 : i32
    %c0_i32_1 = arith.constant 0 : i32
    return %arg0, %c0_i32, %c0_i32_0 : i32, i32, i32
  }
  func.func @transform_1(%arg0: i32) -> (i32, i32) {
    %c0_i32 = arith.constant 0 : i32
    %c0_i32_0 = arith.constant 0 : i32
    %c0_i32_1 = arith.constant 0 : i32
    return %c0_i32, %c0_i32_0 : i32, i32
  }
  func.func @transform_2(%arg0: i32) -> (i32, i32) {
    %c0_i32 = arith.constant 0 : i32
    %c0_i32_0 = arith.constant 0 : i32
    %c0_i32_1 = arith.constant 0 : i32
    return %c0_i32, %c0_i32_0 : i32, i32
  }
  func.func @transform_3(%arg0: i32) -> (i32, i32) {
    %c0_i32 = arith.constant 0 : i32
    %c0_i32_0 = arith.constant 0 : i32
    %c0_i32_1 = arith.constant 0 : i32
    return %c0_i32, %c0_i32_0 : i32, i32
  }
  func.func @transform_4(%arg0: i32) -> (i32, i32) {
    %c0_i32 = arith.constant 0 : i32
    %c0_i32_0 = arith.constant 0 : i32
    %c0_i32_1 = arith.constant 0 : i32
    return %c0_i32, %c0_i32_0 : i32, i32
  }
  func.func @transform_5(%arg0: i32) -> (i32, i32) {
    %c0_i32 = arith.constant 0 : i32
    %c0_i32_0 = arith.constant 0 : i32
    %c0_i32_1 = arith.constant 0 : i32
    return %c0_i32, %c0_i32_0 : i32, i32
  }
  func.func @transform_6(%arg0: i32) -> (i32, i32, i32) {
    %c0_i32 = arith.constant 0 : i32
    %c0_i32_0 = arith.constant 0 : i32
    %c0_i32_1 = arith.constant 0 : i32
    return %arg0, %c0_i32, %c0_i32_0 : i32, i32, i32
  }
}

</mosaic_0001>

<bundles_post_ra>
// kernel: transformer_encoder_forward.3
= control target key start
LH: loop header
LB: loop body
LE: loop exit
PB: predicated region body
PF: predicated region fallthrough
CT: control target
= control target key end

     0   :  { %vm83_vm0 = vcmask 261120   ;;  %v952_v15 = vmov 0.0   ;;  %vm953_vm1 = vmmov 0   ;;  %s955_s26 = smov 96   ;;  %v957_v40 = vmov 0   ;;  %s959_s17 = smov 64   ;;  %s1225_s0 = inlined_call_operand.vmem [shape: bf16[1,16,32], index: 0, kind: input, shape index: {}]   ;;  %s1226_s6 = inlined_call_operand.vmem [shape: bf16[32,96], index: 6, kind: input, shape index: {}]   ;;  %s1227_s4 = inlined_call_operand.vmem [shape: f32[1,32], index: 4, kind: input, shape index: {}]   ;;  %s1228_s5 = inlined_call_operand.vmem [shape: f32[1,32], index: 5, kind: input, shape index: {}]   ;;  %s1229_s2 = inlined_call_operand.vmem [shape: s32[1,16,1], index: 2, kind: input, shape index: {}]   ;;  %s1230_s3 = inlined_call_operand.vmem [shape: s32[1,1,16], index: 3, kind: input, shape index: {}]   ;;  %s1231_s1 = inlined_call_operand.vmem [shape: f32[1,16,1], index: 1, kind: input, shape index: {}]   ;;  %s1232_s7 = inlined_call_operand.vmem [shape: bf16[32,32], index: 7, kind: input, shape index: {}]   ;;  %s1233_s8 = inlined_call_operand.vmem [shape: f32[1,32], index: 8, kind: input, shape index: {}]   ;;  %s1234_s11 = inlined_call_operand.vmem [shape: bf16[32,64], index: 11, kind: input, shape index: {}]   ;;  %s1235_s13 = inlined_call_operand.vmem [shape: bf16[64,32], index: 13, kind: input, shape index: {}]   ;;  %s1236_s9 = inlined_call_operand.vmem [shape: f32[1,32], index: 9, kind: input, shape index: {}]   ;;  %s1237_s10 = inlined_call_operand.vmem [shape: f32[1,32], index: 10, kind: input, shape index: {}]   ;;  %s1238_s12 = inlined_call_operand.vmem [shape: f32[1,64], index: 12, kind: input, shape index: {}]   ;;  %s1239_s14 = inlined_call_operand.vmem [shape: f32[1,32], index: 14, kind: input, shape index: {}]   ;;  %s1240_s15 = inlined_call_operand.vmem [shape: bf16[1,16,32], index: 15, kind: output, shape index: {}]  }
   0x1   :  { %v818_v0 = vld [vmem:[%s1225_s0] sm:$0xff]   ;;  %844 = vmatprep.subr.bf16.mxu1 %v952_v15  ;;  %v918_v16 = vld [vmem:[%s1226_s6 + $0x8] sm:$0xff]   ;;  %848 = vmatprep.mubr.msk.bf16.mxu1 %vm953_vm1, %v952_v15  ;;  %vm192_vm2 = vcmask 130048   ;;  %v60_v48 = vlaneseq  ;;  %vm722_vm9 = vcmask 523264   ;;  %vm779_vm10 = vcmask 257024  }
   0x2   :  { %v1043_v1 = vunpack.c.l.bf16 %v818_v0  ;;  %v1045_v2 = vunpack.c.h.bf16 %v818_v0  ;;  %858 = vmatprep.subr.bf16.mxu0 %v952_v15  ;;  %860 = vmatprep.mubr.msk.bf16.mxu0 %vm953_vm1, %v952_v15  ;;  %v919_v17 = vld [vmem:[%s1226_s6] sm:$0xff]   ;;  %v58_v41 = vld [vmem:[%s1229_s2 + $0x8] sm:$0xff] }
   0x3   :  { %845 = vmatpush3.bf16.msra.mxu1 %v918_v16  ;;  %v787_v26 = vld [vmem:[%s1227_s4] ss:$0 sm:$0xff]  ;;  %s954_s4 = smov 80   ;;  %917 = vset.pattern.permute.xlu0 %v957_v40  ;;  %v61_v49 = vshrl.u32 %v60_v48, 7  ;;  %v64_v50 = vand.u32 127, %v60_v48  ;;  %v921_v55 = vld [vmem:[%s1232_s7 + $0x8] sm:$0xff]  }
   0x4   :  { %v84_v3 = vsel %vm83_vm0, %v1043_v1, 0.0  ;;  %v87_v4 = vsel %vm83_vm0, %v1045_v2, 0.0  ;;  %846 = vmatprep.subr.bf16.mxu1 %v952_v15  ;;  %v788_v30 = vld [vmem:[%s1228_s5] ss:$0 sm:$0xff]  ;;  %s956_s5 = smov 112   ;;  %916 = vset.pattern.permute.xlu1 %v957_v40 }
   0x5   :  { %85 = vadd.xlane.f32.xlu0 %v84_v3  ;;  %v57_v42 = vld [vmem:[%s1229_s2] sm:$0xff]  ;;  %vm77_vm3 = vcmp.le.s32.totalorder %v64_v50, %v61_v49  ;;  %v62_v53 = vadd.s32 8, %v61_v49 }
   0x6   :  { %v786_v51 = vld [vmem:[%s1230_s3] ss:$0 sm:$0xff]  ;;  %s958_s3 = smov 48  }
   0x7   :  { %847 = vmatpush3.bf16.msra.mxu1 %v919_v17  ;;  %vm78_vm6 = vcmp.le.s32.totalorder %v64_v50, %v62_v53 }
   0x8   :  { %852 = vmatprep.subr.bf16.mxu1 %v952_v15 }
   0x9   :  { %88 = vadd.xlane.f32.xlu0 %v87_v4 }
  0x8e   :  { %v86_v5 = vpop.xlane.xlu0 %85 }
  0x8f   :  { %v91_v6 = vmul.f32 0.03125, %v86_v5 }
  0x91   :  { %v93_v7 = vsub.f32 %v1043_v1, %v91_v6 }
  0x92   :  { %v89_v8 = vpop.xlane.xlu0 %88 }
  0x93   :  { %v92_v9 = vmul.f32 0.03125, %v89_v8  ;;  %v95_v10 = vmul.f32 %v93_v7, %v93_v7 }
  0x95   :  { %v94_v11 = vsub.f32 %v1045_v2, %v92_v9  ;;  %v97_v12 = vsel %vm83_vm0, %v95_v10, 0.0 }
  0x96   :  { %98 = vadd.xlane.f32.xlu1 %v97_v12 }
  0x97   :  { %v96_v13 = vmul.f32 %v94_v11, %v94_v11 }
  0x99   :  { %v100_v14 = vsel %vm83_vm0, %v96_v13, 0.0 }
  0x9a   :  { %101 = vadd.xlane.f32.xlu1 %v100_v14 }
 0x11f   :  { %v99_v18 = vpop.xlane.xlu1 %98 }
 0x120   :  { %v103_v19 = vmul.f32 0.03125, %v99_v18 }
 0x122   :  { %v105_v20 = vadd.f32 1e-05, %v103_v19 }
 0x123   :  { %v102_v21 = vpop.xlane.xlu1 %101 }
 0x124   :  { %928 = vrsqrt.f32 %v105_v20  ;;  %v104_v22 = vmul.f32 0.03125, %v102_v21 }
 0x126   :  { %v106_v23 = vadd.f32 1e-05, %v104_v22 }
 0x128   :  { %930 = vrsqrt.f32 %v106_v23 }
 0x131   :  { %v929_v24 = vpop.eup %928 }
 0x132   :  { %v109_v25 = vmul.f32 %v929_v24, %v93_v7 }
 0x134   :  { %v117_v29 = vmul.f32 %v787_v26, %v109_v25 }
 0x135   :  { %v931_v27 = vpop.eup %930 }
 0x136   :  { %v110_v28 = vmul.f32 %v931_v27, %v94_v11  ;;  %v125_v32 = vadd.f32 %v788_v30, %v117_v29 }
 0x138   :  { %v118_v31 = vmul.f32 %v787_v26, %v110_v28 }
 0x13a   :  { %v126_v33 = vadd.f32 %v788_v30, %v118_v31 }
 0x13c   :  { %v127_v34 = vpack.c.bf16 %v126_v33, %v125_v32 }
 0x13e   :  { %849 = vmatmul.mubr.msk.bf16.vlgmr.msra.gmra.mxu1 %vm83_vm0, %v127_v34 }
 0x13f   :  { %854 = vmatprep.mubr.msk.bf16.mxu1 %vm953_vm1, %v952_v15 }
 0x1fe   :  { %v181_v35 = vpop.f32.mrf.mxu1 }
 0x200   :  { %v850_v36 = vpop.f32.mrf.mxu1 }
 0x201   :  { %v55_v36 = vld [vmem:[%s1231_s1] sm:$0xff] }
 0x202   :  { %v184_v37 = vpop.f32.mrf.mxu1 }
 0x203   :  { %v1078_v38 = vpack.c.bf16 %v184_v37, %v181_v35  ;;  %v56_v37 = vld [vmem:[%s1231_s1 + $0x8] sm:$0xff] }
 0x204   :  { %v851_v39 = vpop.f32.mrf.mxu1 }
 0x205   :  { %319 = vrot.lane.b32.xlu1 %v1078_v38, %s954_s4  ;;  %190 = vrot.lane.b32.xlu0 %v1078_v38, %s955_s26 }
 0x209   :  { %317 = vrot.lane.b32.xlu1 %v1078_v38, %s956_s5  ;;  %69 = vperm.xlu0 %917, %v58_v41  }
 0x20d   :  { %66 = vperm.xlu1 %916, %v57_v42  }
 0x277   :  { %v191_v43 = vpop.permute.xlu0 %190  ;;  %v320_v45 = vpop.permute.xlu1 %319 }
 0x278   :  { %v197_v44 = vsel %vm192_vm2, %v191_v43, 0  ;;  %v325_v46 = vsel %vm192_vm2, %v320_v45, 0 }
 0x279   :  { %853 = vmatpush3.bf16.xpose.msra.mxu1 %v197_v44 }
 0x27a   :  { %864 = vmatprep.subr.bf16.mxu1 %v952_v15 }
 0x27b   :  { %v318_v47 = vpop.permute.xlu1 %317 }
 0x280   :  { %855 = vmatmul.mubr.msk.bf16.vlgmr.msra.gmra.mxu1 %vm192_vm2, %v1078_v38 }
 0x281   :  { %865 = vmatpush3.bf16.xpose.msra.mxu1 %v325_v46  ;;  %866 = vmatprep.mubr.msk.bf16.mxu1 %vm953_vm1, %v952_v15 }
 0x282   :  { %876 = vmatprep.subr.bf16.mxu1 %v952_v15 }
 0x284   :  { %v70_v54 = vpop.permute.xlu0 %69 }
 0x285   :  { %vm76_vm7 = vcmp.eq.s32.totalorder %v70_v54, %v786_v51  ;;  %v920_v54 = vld [vmem:[%s1232_s7] sm:$0xff]  }
 0x286   :  { %vm1109_vm8 = vmand %vm76_vm7, %vm78_vm6 }
 0x288   :  { %867 = vmatmul.mubr.msk.bf16.vlgmr.msra.gmra.mxu1 %vm192_vm2, %v318_v47  ;;  %v67_v52 = vpop.permute.xlu1 %66 }
 0x289   :  { %878 = vmatprep.mubr.msk.bf16.mxu1 %vm953_vm1, %v952_v15  ;;  %vm75_vm4 = vcmp.eq.s32.totalorder %v67_v52, %v786_v51  ;;  %877 = vmatpush3.bf16.msra.mxu1 %v921_v55  ;;  %v926_v55 = vld [vmem:[%s1235_s13 + $0x8] sm:$0xff]  }
 0x28a   :  { %vm1103_vm5 = vmand %vm75_vm4, %vm77_vm3  ;;  %888 = vmatprep.subr.bf16.mxu1 %v952_v15 }
 0x340   :  { %v233_v56 = vpop.f32.mrf.mxu1 }
 0x341   :  { %v240_v57 = vmul.f32 0.25, %v233_v56 }
 0x342   :  { %v856_v58 = vpop.f32.mrf.mxu1 }
 0x343   :  { %v242_v59 = vsel %vm1103_vm5, %v240_v57, -1e+09 }
 0x344   :  { %v236_v61 = vpop.f32.mrf.mxu1  ;;  %v244_v62 = vsel %vm192_vm2, %v242_v59, -inf }
 0x345   :  { %v241_v63 = vmul.f32 0.25, %v236_v61  ;;  %245 = vmax.xlane.f32.xlu1 %v244_v62 }
 0x346   :  { %v857_v0 = vpop.f32.mrf.mxu1 }
 0x347   :  { %v243_v3 = vsel %vm1109_vm8, %v241_v63, -1e+09 }
 0x348   :  { %v361_v4 = vpop.f32.mrf.mxu1  ;;  %v247_v5 = vsel %vm192_vm2, %v243_v3, -inf }
 0x349   :  { %v368_v6 = vmul.f32 0.25, %v361_v4  ;;  %248 = vmax.xlane.f32.xlu0 %v247_v5 }
 0x34a   :  { %v868_v7 = vpop.f32.mrf.mxu1 }
 0x34b   :  { %v370_v8 = vsel %vm1103_vm5, %v368_v6, -1e+09 }
 0x34c   :  { %v364_v9 = vpop.f32.mrf.mxu1  ;;  %v372_v10 = vsel %vm192_vm2, %v370_v8, -inf }
 0x34d   :  { %v369_v11 = vmul.f32 0.25, %v364_v9  ;;  %373 = vmax.xlane.f32.xlu0 %v372_v10  ;;  %v800_v10 = vld [vmem:[%s1233_s8] ss:$0 sm:$0xff] }
 0x34e   :  { %v869_v12 = vpop.f32.mrf.mxu1 }
 0x34f   :  { %v371_v13 = vsel %vm1109_vm8, %v369_v11, -1e+09 }
 0x350   :  { %v375_v14 = vsel %vm192_vm2, %v371_v13, -inf }
 0x351   :  { %376 = vmax.xlane.f32.xlu1 %v375_v14 }
 0x3ce   :  { %v246_v16 = vpop.xlane.xlu1 %245 }
 0x3cf   :  { %v250_v17 = vsub.f32 %v242_v59, %v246_v16 }
 0x3d1   :  { %v252_v18 = vmul.f32 1.442695, %v250_v17 }
 0x3d2   :  { %v249_v19 = vpop.xlane.xlu0 %248 }
 0x3d3   :  { %932 = vpow2.f32 %v252_v18  ;;  %v251_v20 = vsub.f32 %v243_v3, %v249_v19 }
 0x3d5   :  { %v254_v21 = vmul.f32 1.442695, %v251_v20 }
 0x3d6   :  { %v374_v22 = vpop.xlane.xlu0 %373 }
 0x3d7   :  { %934 = vpow2.f32 %v254_v21  ;;  %v378_v23 = vsub.f32 %v370_v8, %v374_v22 }
 0x3d9   :  { %v380_v24 = vmul.f32 1.442695, %v378_v23 }
 0x3da   :  { %v377_v25 = vpop.xlane.xlu1 %376 }
 0x3db   :  { %936 = vpow2.f32 %v380_v24  ;;  %v379_v26 = vsub.f32 %v371_v13, %v377_v25 }
 0x3dd   :  { %v382_v27 = vmul.f32 1.442695, %v379_v26 }
 0x3df   :  { %938 = vpow2.f32 %v382_v27 }
 0x3e0   :  { %v933_v28 = vpop.eup %932 }
 0x3e1   :  { %v256_v29 = vsel %vm192_vm2, %v933_v28, 0.0 }
 0x3e2   :  { %257 = vadd.xlane.f32.xlu0 %v256_v29 }
 0x3e4   :  { %v935_v30 = vpop.eup %934 }
 0x3e5   :  { %v259_v31 = vsel %vm192_vm2, %v935_v30, 0.0 }
 0x3e6   :  { %260 = vadd.xlane.f32.xlu1 %v259_v31 }
 0x3e8   :  { %v937_v32 = vpop.eup %936 }
 0x3e9   :  { %v384_v33 = vsel %vm192_vm2, %v937_v32, 0.0 }
 0x3ea   :  { %385 = vadd.xlane.f32.xlu0 %v384_v33 }
 0x3ec   :  { %v939_v34 = vpop.eup %938 }
 0x3ed   :  { %v387_v35 = vsel %vm192_vm2, %v939_v34, 0.0 }
 0x3ee   :  { %388 = vadd.xlane.f32.xlu1 %v387_v35  ;;  %v923_v35 = vld [vmem:[%s1234_s11] sm:$0xff]  }
 0x3ff   :  { %395 = vrot.lane.b32.xlu1 %v1078_v38, %s958_s3 }
 0x400   :  { %267 = vrot.lane.b32.xlu0 %v1078_v38, %s959_s17 }
 0x403   :  { %558 = vperm.xlu1 %916, %v55_v36   ;;  %v924_v36 = vld [vmem:[%s1235_s13 + $0x18] sm:$0xff]  }
 0x407   :  { %563 = vperm.xlu1 %916, %v56_v37  }
 0x46b   :  { %v258_v39 = vpop.xlane.xlu0 %257 }
 0x46c   :  { %940 = vrcp.f32 %v258_v39 }
 0x46f   :  { %v261_v40 = vpop.xlane.xlu1 %260 }
 0x470   :  { %942 = vrcp.f32 %v261_v40 }
 0x473   :  { %v386_v41 = vpop.xlane.xlu0 %385 }
 0x474   :  { %944 = vrcp.f32 %v386_v41 }
 0x477   :  { %v268_v42 = vpop.permute.xlu0 %267  ;;  %v389_v43 = vpop.xlane.xlu1 %388 }
 0x478   :  { %946 = vrcp.f32 %v389_v43  ;;  %859 = vmatpush3.bf16.msra.mxu0 %v268_v42 }
 0x479   :  { %870 = vmatprep.subr.bf16.mxu0 %v952_v15  ;;  %v941_v38 = vpop.eup %940 }
 0x47a   :  { %v263_v45 = vmul.f32 %v941_v38, %v933_v28 }
 0x47b   :  { %v396_v48 = vpop.permute.xlu1 %395 }
 0x47d   :  { %v943_v44 = vpop.eup %942 }
 0x47e   :  { %v265_v46 = vmul.f32 %v943_v44, %v935_v30 }
 0x47f   :  { %v1161_v13 = vpop.permute.xlu1 %558 }
 0x480   :  { %v266_v47 = vpack.c.bf16 %v265_v46, %v263_v45  ;;  %v801_v45 = vld [vmem:[%s1236_s9] ss:$0 sm:$0xff] }
 0x481   :  { %v945_v49 = vpop.eup %944 }
 0x482   :  { %861 = vmatmul.mubr.msk.bf16.vlgmr.msra.gmra.mxu0 %vm192_vm2, %v266_v47  ;;  %v391_v51 = vmul.f32 %v945_v49, %v937_v32  ;;  %v802_v49 = vld [vmem:[%s1237_s10] ss:$0 sm:$0xff] }
 0x483   :  { %871 = vmatpush3.bf16.msra.mxu0 %v396_v48  ;;  %872 = vmatprep.mubr.msk.bf16.mxu0 %vm953_vm1, %v952_v15  ;;  %v1169_v23 = vpop.permute.xlu1 %563 }
 0x484   :  { %882 = vmatprep.subr.bf16.mxu0 %v952_v15 }
 0x485   :  { %v947_v50 = vpop.eup %946 }
 0x486   :  { %v393_v52 = vmul.f32 %v947_v50, %v939_v34  ;;  %v922_v34 = vld [vmem:[%s1234_s11 + $0x8] sm:$0xff]  }
 0x488   :  { %v394_v53 = vpack.c.bf16 %v393_v52, %v391_v51 }
 0x48a   :  { %873 = vmatmul.mubr.msk.bf16.vlgmr.msra.gmra.mxu0 %vm192_vm2, %v394_v53 }
 0x48b   :  { %884 = vmatprep.mubr.msk.bf16.mxu0 %vm953_vm1, %v952_v15  ;;  %883 = vmatpush3.bf16.msra.mxu0 %v920_v54  ;;  %v925_v54 = vld [vmem:[%s1235_s13 + $0x10] sm:$0xff]  }
 0x48c   :  { %896 = vmatprep.subr.bf16.mxu0 %v952_v15 }
 0x542   :  { %v307_v56 = vpop.f32.mrf.mxu0 }
 0x544   :  { %v862_v57 = vpop.f32.mrf.mxu0 }
 0x545   :  { %v803_v57 = vld [vmem:[%s1238_s12] ss:$0 sm:$0xff] }
 0x546   :  { %v310_v58 = vpop.f32.mrf.mxu0 }
 0x547   :  { %v316_v59 = vpack.c.bf16 %v310_v58, %v307_v56  ;;  %v927_v56 = vld [vmem:[%s1235_s13] sm:$0xff]  }
 0x548   :  { %v863_v60 = vpop.f32.mrf.mxu0 }
 0x549   :  { %885 = vmatmul.mubr.msk.bf16.vlgmr.msra.gmra.mxu0 %vm192_vm2, %v316_v59 }
 0x54a   :  { %v435_v61 = vpop.f32.mrf.mxu0  ;;  %904 = vmatprep.mubr.msk.bf16.mxu0 %vm953_vm1, %v952_v15  ;;  %897 = vmatpush3.bf16.msra.mxu0 %v924_v36 }
 0x54b   :  { %898 = vmatprep.subr.bf16.mxu0 %v952_v15 }
 0x54c   :  { %v874_v62 = vpop.f32.mrf.mxu0 }
 0x54e   :  { %v438_v63 = vpop.f32.mrf.mxu0  ;;  %899 = vmatpush3.bf16.msra.mxu0 %v925_v54 }
 0x54f   :  { %v444_v0 = vpack.c.bf16 %v438_v63, %v435_v61  ;;  %900 = vmatprep.subr.bf16.mxu0 %v952_v15 }
 0x550   :  { %v875_v3 = vpop.f32.mrf.mxu0 }
 0x551   :  { %879 = vmatmul.mubr.msk.bf16.vlgmr.msra.gmra.mxu1 %vm192_vm2, %v444_v0 }
 0x552   :  { %892 = vmatprep.mubr.msk.bf16.mxu1 %vm953_vm1, %v952_v15  ;;  %889 = vmatpush3.bf16.msra.mxu1 %v922_v34 }
 0x553   :  { %890 = vmatprep.subr.bf16.mxu1 %v952_v15  ;;  %901 = vmatpush3.bf16.msra.mxu0 %v926_v55 }
 0x554   :  { %902 = vmatprep.subr.bf16.mxu0 %v952_v15  ;;  %v807_v15 = vld [vmem:[%s1239_s14] ss:$0 sm:$0xff] }
 0x556   :  { %891 = vmatpush3.bf16.msra.mxu1 %v923_v35 }
 0x557   :  { %903 = vmatpush3.bf16.msra.mxu0 %v927_v56 }
 0x609   :  { %v538_v4 = vpop.f32.mrf.mxu0 }
 0x60b   :  { %v886_v5 = vpop.f32.mrf.mxu0 }
 0x60d   :  { %v541_v6 = vpop.f32.mrf.mxu0 }
 0x60f   :  { %v887_v7 = vpop.f32.mrf.mxu0 }
 0x611   :  { %v488_v8 = vpop.f32.mrf.mxu1 }
 0x612   :  { %v539_v9 = vadd.f32 %v538_v4, %v488_v8 }
 0x613   :  { %v880_v11 = vpop.f32.mrf.mxu1 }
 0x614   :  { %v545_v12 = vadd.f32 %v1043_v1, %v539_v9 }
 0x615   :  { %v491_v14 = vpop.f32.mrf.mxu1 }
 0x616   :  { %v554_v16 = vadd.f32 %v800_v10, %v545_v12  ;;  %v542_v17 = vadd.f32 %v541_v6, %v491_v14 }
 0x617   :  { %v881_v18 = vpop.f32.mrf.mxu1 }
 0x618   :  { %v546_v19 = vadd.f32 %v1045_v2, %v542_v17  ;;  %v1165_v20 = vmul.f32 %v1161_v13, %v554_v16 }
 0x61a   :  { %v555_v21 = vadd.f32 %v800_v10, %v546_v19  ;;  %v570_v22 = vsel %vm83_vm0, %v1165_v20, 0.0 }
 0x61b   :  { %571 = vadd.xlane.f32.xlu0 %v570_v22 }
 0x61c   :  { %v1172_v1 = vmul.f32 %v1169_v23, %v555_v21 }
 0x61e   :  { %v573_v24 = vsel %vm83_vm0, %v1172_v1, 0.0 }
 0x61f   :  { %574 = vadd.xlane.f32.xlu1 %v573_v24 }
 0x6a4   :  { %v572_v25 = vpop.xlane.xlu0 %571 }
 0x6a5   :  { %v576_v26 = vmul.f32 0.03125, %v572_v25 }
 0x6a7   :  { %v578_v2 = vsub.f32 %v1165_v20, %v576_v26 }
 0x6a8   :  { %v575_v27 = vpop.xlane.xlu1 %574 }
 0x6a9   :  { %v577_v28 = vmul.f32 0.03125, %v575_v27  ;;  %v580_v29 = vmul.f32 %v578_v2, %v578_v2 }
 0x6ab   :  { %v579_v30 = vsub.f32 %v1172_v1, %v577_v28  ;;  %v582_v31 = vsel %vm83_vm0, %v580_v29, 0.0 }
 0x6ac   :  { %583 = vadd.xlane.f32.xlu0 %v582_v31 }
 0x6ad   :  { %v581_v32 = vmul.f32 %v579_v30, %v579_v30 }
 0x6af   :  { %v585_v33 = vsel %vm83_vm0, %v581_v32, 0.0 }
 0x6b0   :  { %586 = vadd.xlane.f32.xlu0 %v585_v33 }
 0x735   :  { %v584_v37 = vpop.xlane.xlu0 %583 }
 0x736   :  { %v588_v39 = vmul.f32 0.03125, %v584_v37 }
 0x738   :  { %v590_v40 = vadd.f32 1e-05, %v588_v39 }
 0x739   :  { %v587_v41 = vpop.xlane.xlu0 %586 }
 0x73a   :  { %948 = vrsqrt.f32 %v590_v40  ;;  %v589_v42 = vmul.f32 0.03125, %v587_v41 }
 0x73c   :  { %v591_v43 = vadd.f32 1e-05, %v589_v42 }
 0x73e   :  { %950 = vrsqrt.f32 %v591_v43 }
 0x747   :  { %v949_v38 = vpop.eup %948 }
 0x748   :  { %v594_v44 = vmul.f32 %v949_v38, %v578_v2 }
 0x74a   :  { %v602_v48 = vmul.f32 %v801_v45, %v594_v44 }
 0x74b   :  { %v951_v46 = vpop.eup %950 }
 0x74c   :  { %v595_v47 = vmul.f32 %v951_v46, %v579_v30  ;;  %v610_v51 = vadd.f32 %v802_v49, %v602_v48 }
 0x74e   :  { %v603_v50 = vmul.f32 %v801_v45, %v595_v47 }
 0x750   :  { %v611_v52 = vadd.f32 %v802_v49, %v603_v50 }
 0x752   :  { %v612_v53 = vpack.c.bf16 %v611_v52, %v610_v51 }
 0x754   :  { %893 = vmatmul.mubr.msk.bf16.vlgmr.msra.gmra.mxu1 %vm83_vm0, %v612_v53 }
 0x814   :  { %v673_v58 = vpop.f32.mrf.mxu1 }
 0x815   :  { %v674_v60 = vadd.f32 %v803_v57, %v673_v58 }
 0x816   :  { %v894_v59 = vpop.f32.mrf.mxu1 }
 0x817   :  { %v680_v0 = vmax.f32 %v674_v60, 0.0 }
 0x818   :  { %v676_v61 = vpop.f32.mrf.mxu1 }
 0x819   :  { %v677_v62 = vadd.f32 %v803_v57, %v676_v61 }
 0x81a   :  { %v895_v63 = vpop.f32.mrf.mxu1 }
 0x81b   :  { %v681_v3 = vmax.f32 %v677_v62, 0.0 }
 0x81d   :  { %v682_v4 = vpack.c.bf16 %v681_v3, %v680_v0 }
 0x81f   :  { %905 = vmatmul.mubr.msk.bf16.vlgmr.msra.gmra.mxu0 %vm722_vm9, %v682_v4 }
 0x8df   :  { %v760_v5 = vpop.f32.mrf.mxu0 }
 0x8e0   :  { %v761_v6 = vadd.f32 %v807_v15, %v760_v5 }
 0x8e1   :  { %v906_v7 = vpop.f32.mrf.mxu0 }
 0x8e2   :  { %v767_v8 = vadd.f32 %v761_v6, %v1165_v20 }
 0x8e3   :  { %v763_v9 = vpop.f32.mrf.mxu0 }
 0x8e4   :  { %v769_v10 = vmul.f32 %v767_v8, %v1161_v13  ;;  %v764_v11 = vadd.f32 %v807_v15, %v763_v9 }
 0x8e5   :  { %v907_v12 = vpop.f32.mrf.mxu0 }
 0x8e6   :  { %v815_v14 = vpack.c.bf16 %v769_v10, %v769_v10  ;;  %v768_v16 = vadd.f32 %v764_v11, %v1172_v1 }
 0x8e8   :  { %780 = vst.msk [vmem:[%s1240_s15] sm:$0xf] %vm779_vm10, %v815_v14  ;;  %v770_v17 = vmul.f32 %v768_v16, %v1169_v23 }
 0x8ea   :  { %v816_v18 = vpack.c.bf16 %v770_v17, %v770_v17 }
 0x8ec   :  { %781 = vst.msk [vmem:[%s1240_s15 + $0x4] sm:$0xf] %vm779_vm10, %v816_v18 }

// kernel: transformer_encoder_forward.5
= control target key start
LH: loop header
LB: loop body
LE: loop exit
PB: predicated region body
PF: predicated region fallthrough
CT: control target
= control target key end

     0   :  { %vm101_vm0 = vcmask 254976   ;;  %v1245_v0 = vmov 0.0   ;;  %vm1246_vm1 = vmmov 0   ;;  %vm54_vm2 = vcmask 261120   ;;  %s1247_s7 = smov 64   ;;  %s1249_s8 = smov 96   ;;  %s1488_s1 = inlined_call_operand.vmem [shape: bf16[32,128], index: 1, kind: input, shape index: {}]   ;;  %s1489_s2 = inlined_call_operand.vmem [shape: bf16[32,128], index: 2, kind: input, shape index: {}]   ;;  %s1490_s0 = inlined_call_operand.vmem [shape: bf16[1,16,32], index: 0, kind: input, shape index: {}]   ;;  %s1491_s3 = inlined_call_operand.vmem [shape: f32[1,128], index: 3, kind: input, shape index: {}]   ;;  %s1492_s4 = inlined_call_operand.vmem [shape: bf16[32,32], index: 4, kind: input, shape index: {}]   ;;  %s1493_s5 = inlined_call_operand.vmem [shape: f32[1,32], index: 5, kind: input, shape index: {}]   ;;  %s1494_s6 = inlined_call_operand.vmem [shape: f32[1,16,32], index: 6, kind: output, shape index: {}]  }
   0x1   :  { %1075 = vmatprep.subr.bf16.mxu0 %v1245_v0  ;;  %v1160_v1 = vld [vmem:[%s1488_s1 + $0x8] sm:$0xff]   ;;  %1083 = vmatprep.subr.bf16.mxu1 %v1245_v0  ;;  %102 = vst.msk [vmem:[#allocation4] sm:$0x3] %vm101_vm0, %v1245_v0  ;;  %103 = vst.msk [vmem:[#allocation5] sm:$0x3] %vm101_vm0, %v1245_v0  ;;  %v1161_v2 = vld [vmem:[%s1488_s1] sm:$0xff]  }
   0x2   :  { %1079 = vmatprep.mubr.msk.bf16.mxu0 %vm1246_vm1, %v1245_v0  ;;  %1087 = vmatprep.mubr.msk.bf16.mxu1 %vm1246_vm1, %v1245_v0  ;;  %v1162_v3 = vld [vmem:[%s1489_s2 + $0x8] sm:$0xff]   ;;  %v1164_v4 = vld [vmem:[%s1489_s2] sm:$0xff]  }
   0x3   :  { %1076 = vmatpush3.bf16.msra.mxu0 %v1160_v1  ;;  %1084 = vmatpush3.bf16.msra.mxu1 %v1162_v3  ;;  %v1163_v5 = vld [vmem:[%s1490_s0] sm:$0xff]   ;;  %v1165_v34 = vld [vmem:[%s1489_s2 + $0x8] sm:$0xff]  }
   0x4   :  { %1077 = vmatprep.subr.bf16.mxu0 %v1245_v0  ;;  %1085 = vmatprep.subr.bf16.mxu1 %v1245_v0  ;;  %v1004_v8 = vld [vmem:[%s1491_s3] ss:$0 sm:$0xff]  ;;  %s1248_s3 = smov 32   ;;  %v1167_v61 = vld [vmem:[%s1489_s2 + $0x8] sm:$0xff]  }
   0x5   :  { %v1166_v35 = vld [vmem:[%s1489_s2] sm:$0xff]  }
   0x6   :  { %v1168_v62 = vld [vmem:[%s1489_s2] sm:$0xff]  }
   0x7   :  { %1078 = vmatpush3.bf16.msra.mxu0 %v1161_v2  ;;  %1086 = vmatpush3.bf16.msra.mxu1 %v1164_v4 }
   0x8   :  { %v105_v6 = vld [vmem:[#allocation4] sm:$0x3]  ;;  %1091 = vmatprep.subr.bf16.mxu0 %v1245_v0  ;;  %1099 = vmatprep.subr.bf16.mxu1 %v1245_v0  ;;  %v174_v22 = vld [vmem:[#allocation5] sm:$0x3] }
   0x9   :  { %v106_v7 = vpack.c.bf16 %v105_v6, %v105_v6 }
   0xa   :  { %1080 = vmatmul.mubr.msk.bf16.vlgmr.msra.gmra.mxu0 %vm54_vm2, %v1163_v5 }
   0xb   :  { %1095 = vmatprep.mubr.msk.bf16.mxu0 %vm1246_vm1, %v1245_v0  ;;  %1088 = vmatmul.mubr.msk.bf16.vlgmr.msra.gmra.mxu1 %vm54_vm2, %v106_v7 }
   0xc   :  { %1103 = vmatprep.mubr.msk.bf16.mxu1 %vm1246_vm1, %v1245_v0  ;;  %1092 = vmatpush3.bf16.msra.mxu0 %v1165_v34 }
   0xd   :  { %1093 = vmatprep.subr.bf16.mxu0 %v1245_v0  ;;  %1100 = vmatpush3.bf16.msra.mxu1 %v1167_v61 }
   0xe   :  { %1101 = vmatprep.subr.bf16.mxu1 %v1245_v0 }
  0x10   :  { %1094 = vmatpush3.bf16.msra.mxu0 %v1166_v35 }
  0x11   :  { %1107 = vmatprep.subr.bf16.mxu0 %v1245_v0  ;;  %1102 = vmatpush3.bf16.msra.mxu1 %v1168_v62 }
  0x12   :  { %1115 = vmatprep.subr.bf16.mxu1 %v1245_v0 }
  0xca   :  { %v92_v9 = vpop.f32.mrf.mxu0 }
  0xcb   :  { %v93_v10 = vadd.f32 %v1004_v8, %v92_v9  ;;  %v160_v12 = vpop.f32.mrf.mxu1 }
  0xcc   :  { %v1081_v11 = vpop.f32.mrf.mxu0 }
  0xcd   :  { %99 = vst [vmem:[#allocation2] sm:$0xff] %v93_v10  ;;  %v1089_v14 = vpop.f32.mrf.mxu1 }
  0xce   :  { %v95_v13 = vpop.f32.mrf.mxu0 }
  0xcf   :  { %v96_v15 = vadd.f32 %v1004_v8, %v95_v13  ;;  %v163_v17 = vpop.f32.mrf.mxu1 }
  0xd0   :  { %v1082_v16 = vpop.f32.mrf.mxu0 }
  0xd1   :  { %100 = vst [vmem:[#allocation2 + $0x8] sm:$0xff] %v96_v15  ;;  %v1090_v18 = vpop.f32.mrf.mxu1 }
  0xd4   :  { %v104_v19 = vld [vmem:[#allocation2] sm:$0x3]  ;;  %v207_v43 = vld [vmem:[#allocation2 + $0x2] sm:$0x3]  ;;  %v310_v7 = vld [vmem:[#allocation2 + $0x4] sm:$0x3] }
  0xd5   :  { %v166_v20 = vadd.f32 %v160_v12, %v104_v19  ;;  %v413_v34 = vld [vmem:[#allocation2 + $0x6] sm:$0x3] }
  0xd7   :  { %1181 = vtanh.f32 %v166_v20  ;;  %v1012_v23 = vmul.f32 -1.442695, %v166_v20 }
  0xd8   :  { %v516_v61 = vld [vmem:[#allocation2 + $0x8] sm:$0x3] }
  0xd9   :  { %1183 = vpow2.f32 %v1012_v23 }
  0xe4   :  { %v1182_v21 = vpop.eup %1181 }
  0xe5   :  { %181 = vrot.lane.b32.xlu0 %v1182_v21, %s1247_s7 }
  0xe6   :  { %v1184_v24 = vpop.eup %1183 }
  0xe7   :  { %v170_v25 = vadd.f32 1.0, %v1184_v24 }
  0xe9   :  { %176 = vrot.lane.b32.xlu0 %v174_v22, %s1248_s3  ;;  %1185 = vrcp.f32 %v170_v25  ;;  %v1169_v25 = vld [vmem:[%s1489_s2 + $0x8] sm:$0xff]  }
  0xf6   :  { %v1186_v26 = vpop.eup %1185 }
 0x157   :  { %v182_v27 = vpop.permute.xlu0 %181 }
 0x158   :  { %v184_v28 = vmul.f32 %v1186_v26, %v182_v27 }
 0x15a   :  { %186 = vrot.lane.b32.xlu1 %v184_v28, %s1248_s3 }
 0x15b   :  { %v177_v29 = vpop.permute.xlu0 %176 }
 0x15c   :  { %v179_v30 = vmul.f32 %v1186_v26, %v177_v29 }
 0x1cc   :  { %v187_v31 = vpop.permute.xlu1 %186 }
 0x1cd   :  { %v189_v32 = vadd.f32 %v187_v31, %v179_v30 }
 0x1cf   :  { %1187 = vtanh.f32 %v189_v32 }
 0x1dc   :  { %v1188_v33 = vpop.eup %1187 }
 0x1dd   :  { %192 = vrot.lane.b32.xlu1 %v1188_v33, %s1247_s7 }
 0x1e1   :  { %197 = vrot.lane.b32.xlu1 %v189_v32, %s1249_s8 }
 0x24f   :  { %v193_v36 = vpop.permute.xlu1 %192 }
 0x250   :  { %v195_v37 = vmul.f32 %v1186_v26, %v193_v36  ;;  %v1170_v26 = vld [vmem:[%s1489_s2] sm:$0xff]  }
 0x252   :  { %202 = vrot.lane.b32.xlu0 %v195_v37, %s1248_s3 }
 0x253   :  { %v198_v38 = vpop.permute.xlu1 %197 }
 0x254   :  { %200 = vst.msk [vmem:[#allocation5] sm:$0x3] %vm101_vm0, %v198_v38 }
 0x25b   :  { %v277_v39 = vld [vmem:[#allocation5] sm:$0x3] }
 0x25c   :  { %279 = vrot.lane.b32.xlu1 %v277_v39, %s1248_s3 }
 0x2c4   :  { %v203_v40 = vpop.permute.xlu0 %202 }
 0x2c5   :  { %205 = vst.msk [vmem:[#allocation4] sm:$0x3] %vm101_vm0, %v203_v40  ;;  %206 = vst.msk [vmem:[#allocation3] sm:$0x3] %vm101_vm0, %v203_v40 }
 0x2cc   :  { %v208_v41 = vld [vmem:[#allocation4] sm:$0x3] }
 0x2cd   :  { %v209_v42 = vpack.c.bf16 %v208_v41, %v208_v41 }
 0x2ce   :  { %v280_v56 = vpop.permute.xlu1 %279 }
 0x2cf   :  { %1096 = vmatmul.mubr.msk.bf16.vlgmr.msra.gmra.mxu0 %vm54_vm2, %v209_v42 }
 0x2d0   :  { %1111 = vmatprep.mubr.msk.bf16.mxu0 %vm1246_vm1, %v1245_v0  ;;  %1108 = vmatpush3.bf16.msra.mxu0 %v1169_v25  ;;  %v619_v25 = vld [vmem:[#allocation2 + $0xa] sm:$0x3] }
 0x2d1   :  { %1109 = vmatprep.subr.bf16.mxu0 %v1245_v0 }
 0x2d4   :  { %1110 = vmatpush3.bf16.msra.mxu0 %v1170_v26 }
 0x2d5   :  { %1123 = vmatprep.subr.bf16.mxu0 %v1245_v0 }
 0x38f   :  { %v263_v44 = vpop.f32.mrf.mxu0 }
 0x390   :  { %v269_v45 = vadd.f32 %v263_v44, %v207_v43 }
 0x391   :  { %v1097_v46 = vpop.f32.mrf.mxu0 }
 0x392   :  { %1189 = vtanh.f32 %v269_v45  ;;  %v1016_v50 = vmul.f32 -1.442695, %v269_v45 }
 0x393   :  { %v266_v47 = vpop.f32.mrf.mxu0 }
 0x394   :  { %1191 = vpow2.f32 %v1016_v50 }
 0x395   :  { %v1098_v48 = vpop.f32.mrf.mxu0 }
 0x39f   :  { %v1190_v49 = vpop.eup %1189 }
 0x3a0   :  { %284 = vrot.lane.b32.xlu0 %v1190_v49, %s1247_s7 }
 0x3a1   :  { %v1192_v51 = vpop.eup %1191 }
 0x3a2   :  { %v273_v52 = vadd.f32 1.0, %v1192_v51 }
 0x3a4   :  { %1193 = vrcp.f32 %v273_v52  ;;  %v1171_v52 = vld [vmem:[%s1489_s2 + $0x8] sm:$0xff]  }
 0x3b1   :  { %v1194_v53 = vpop.eup %1193 }
 0x3b2   :  { %v282_v57 = vmul.f32 %v1194_v53, %v280_v56 }
 0x412   :  { %v285_v54 = vpop.permute.xlu0 %284 }
 0x413   :  { %v287_v55 = vmul.f32 %v1194_v53, %v285_v54 }
 0x415   :  { %289 = vrot.lane.b32.xlu0 %v287_v55, %s1248_s3 }
 0x487   :  { %v290_v58 = vpop.permute.xlu0 %289 }
 0x488   :  { %v292_v59 = vadd.f32 %v290_v58, %v282_v57 }
 0x48a   :  { %1195 = vtanh.f32 %v292_v59 }
 0x497   :  { %v1196_v60 = vpop.eup %1195 }
 0x498   :  { %295 = vrot.lane.b32.xlu1 %v1196_v60, %s1247_s7 }
 0x49c   :  { %300 = vrot.lane.b32.xlu1 %v292_v59, %s1249_s8 }
 0x50a   :  { %v296_v63 = vpop.permute.xlu1 %295 }
 0x50b   :  { %v298_v1 = vmul.f32 %v1194_v53, %v296_v63  ;;  %v1172_v53 = vld [vmem:[%s1489_s2] sm:$0xff]  }
 0x50d   :  { %305 = vrot.lane.b32.xlu0 %v298_v1, %s1248_s3 }
 0x50e   :  { %v301_v2 = vpop.permute.xlu1 %300 }
 0x50f   :  { %303 = vst.msk [vmem:[#allocation5] sm:$0x3] %vm101_vm0, %v301_v2 }
 0x516   :  { %v380_v3 = vld [vmem:[#allocation5] sm:$0x3] }
 0x517   :  { %382 = vrot.lane.b32.xlu1 %v380_v3, %s1248_s3 }
 0x57f   :  { %v306_v4 = vpop.permute.xlu0 %305 }
 0x580   :  { %308 = vst.msk [vmem:[#allocation4] sm:$0x3] %vm101_vm0, %v306_v4  ;;  %309 = vst.msk [vmem:[#allocation3 + $0x2] sm:$0x3] %vm101_vm0, %v306_v4 }
 0x587   :  { %v311_v5 = vld [vmem:[#allocation4] sm:$0x3] }
 0x588   :  { %v312_v6 = vpack.c.bf16 %v311_v5, %v311_v5 }
 0x589   :  { %v383_v20 = vpop.permute.xlu1 %382 }
 0x58a   :  { %1104 = vmatmul.mubr.msk.bf16.vlgmr.msra.gmra.mxu1 %vm54_vm2, %v312_v6 }
 0x58b   :  { %1119 = vmatprep.mubr.msk.bf16.mxu1 %vm1246_vm1, %v1245_v0  ;;  %1116 = vmatpush3.bf16.msra.mxu1 %v1171_v52  ;;  %v722_v52 = vld [vmem:[#allocation2 + $0xc] sm:$0x3] }
 0x58c   :  { %1117 = vmatprep.subr.bf16.mxu1 %v1245_v0 }
 0x58f   :  { %1118 = vmatpush3.bf16.msra.mxu1 %v1172_v53 }
 0x590   :  { %1131 = vmatprep.subr.bf16.mxu1 %v1245_v0 }
 0x64a   :  { %v366_v8 = vpop.f32.mrf.mxu1 }
 0x64b   :  { %v372_v9 = vadd.f32 %v366_v8, %v310_v7 }
 0x64c   :  { %v1105_v10 = vpop.f32.mrf.mxu1 }
 0x64d   :  { %1197 = vtanh.f32 %v372_v9  ;;  %v1020_v14 = vmul.f32 -1.442695, %v372_v9 }
 0x64e   :  { %v369_v11 = vpop.f32.mrf.mxu1 }
 0x64f   :  { %1199 = vpow2.f32 %v1020_v14 }
 0x650   :  { %v1106_v12 = vpop.f32.mrf.mxu1 }
 0x65a   :  { %v1198_v13 = vpop.eup %1197 }
 0x65b   :  { %387 = vrot.lane.b32.xlu0 %v1198_v13, %s1247_s7 }
 0x65c   :  { %v1200_v15 = vpop.eup %1199 }
 0x65d   :  { %v376_v16 = vadd.f32 1.0, %v1200_v15 }
 0x65f   :  { %1201 = vrcp.f32 %v376_v16  ;;  %v1173_v16 = vld [vmem:[%s1489_s2 + $0x8] sm:$0xff]  }
 0x66c   :  { %v1202_v17 = vpop.eup %1201 }
 0x66d   :  { %v385_v21 = vmul.f32 %v1202_v17, %v383_v20 }
 0x6cd   :  { %v388_v18 = vpop.permute.xlu0 %387 }
 0x6ce   :  { %v390_v19 = vmul.f32 %v1202_v17, %v388_v18 }
 0x6d0   :  { %392 = vrot.lane.b32.xlu0 %v390_v19, %s1248_s3 }
 0x742   :  { %v393_v22 = vpop.permute.xlu0 %392 }
 0x743   :  { %v395_v23 = vadd.f32 %v393_v22, %v385_v21 }
 0x745   :  { %1203 = vtanh.f32 %v395_v23 }
 0x752   :  { %v1204_v24 = vpop.eup %1203 }
 0x753   :  { %398 = vrot.lane.b32.xlu1 %v1204_v24, %s1247_s7 }
 0x757   :  { %403 = vrot.lane.b32.xlu1 %v395_v23, %s1249_s8 }
 0x7c5   :  { %v399_v27 = vpop.permute.xlu1 %398 }
 0x7c6   :  { %v401_v28 = vmul.f32 %v1202_v17, %v399_v27  ;;  %v1174_v17 = vld [vmem:[%s1489_s2] sm:$0xff]  }
 0x7c8   :  { %408 = vrot.lane.b32.xlu0 %v401_v28, %s1248_s3 }
 0x7c9   :  { %v404_v29 = vpop.permute.xlu1 %403 }
 0x7ca   :  { %406 = vst.msk [vmem:[#allocation5] sm:$0x3] %vm101_vm0, %v404_v29 }
 0x7d1   :  { %v483_v30 = vld [vmem:[#allocation5] sm:$0x3] }
 0x7d2   :  { %485 = vrot.lane.b32.xlu1 %v483_v30, %s1248_s3 }
 0x83a   :  { %v409_v31 = vpop.permute.xlu0 %408 }
 0x83b   :  { %411 = vst.msk [vmem:[#allocation4] sm:$0x3] %vm101_vm0, %v409_v31  ;;  %412 = vst.msk [vmem:[#allocation3 + $0x4] sm:$0x3] %vm101_vm0, %v409_v31 }
 0x842   :  { %v414_v32 = vld [vmem:[#allocation4] sm:$0x3] }
 0x843   :  { %v415_v33 = vpack.c.bf16 %v414_v32, %v414_v32 }
 0x844   :  { %v486_v47 = vpop.permute.xlu1 %485 }
 0x845   :  { %1112 = vmatmul.mubr.msk.bf16.vlgmr.msra.gmra.mxu0 %vm54_vm2, %v415_v33 }
 0x846   :  { %1127 = vmatprep.mubr.msk.bf16.mxu0 %vm1246_vm1, %v1245_v0  ;;  %1124 = vmatpush3.bf16.msra.mxu0 %v1173_v16  ;;  %v825_v16 = vld [vmem:[#allocation2 + $0xe] sm:$0x3] }
 0x847   :  { %1125 = vmatprep.subr.bf16.mxu0 %v1245_v0 }
 0x84a   :  { %1126 = vmatpush3.bf16.msra.mxu0 %v1174_v17 }
 0x84b   :  { %1139 = vmatprep.subr.bf16.mxu0 %v1245_v0 }
 0x905   :  { %v469_v35 = vpop.f32.mrf.mxu0 }
 0x906   :  { %v475_v36 = vadd.f32 %v469_v35, %v413_v34 }
 0x907   :  { %v1113_v37 = vpop.f32.mrf.mxu0 }
 0x908   :  { %1205 = vtanh.f32 %v475_v36  ;;  %v1024_v41 = vmul.f32 -1.442695, %v475_v36 }
 0x909   :  { %v472_v38 = vpop.f32.mrf.mxu0 }
 0x90a   :  { %1207 = vpow2.f32 %v1024_v41 }
 0x90b   :  { %v1114_v39 = vpop.f32.mrf.mxu0 }
 0x915   :  { %v1206_v40 = vpop.eup %1205 }
 0x916   :  { %490 = vrot.lane.b32.xlu0 %v1206_v40, %s1247_s7 }
 0x917   :  { %v1208_v42 = vpop.eup %1207 }
 0x918   :  { %v479_v43 = vadd.f32 1.0, %v1208_v42 }
 0x91a   :  { %1209 = vrcp.f32 %v479_v43  ;;  %v1175_v43 = vld [vmem:[%s1489_s2 + $0x8] sm:$0xff]  }
 0x927   :  { %v1210_v44 = vpop.eup %1209 }
 0x928   :  { %v488_v48 = vmul.f32 %v1210_v44, %v486_v47 }
 0x988   :  { %v491_v45 = vpop.permute.xlu0 %490 }
 0x989   :  { %v493_v46 = vmul.f32 %v1210_v44, %v491_v45 }
 0x98b   :  { %495 = vrot.lane.b32.xlu0 %v493_v46, %s1248_s3 }
 0x9fd   :  { %v496_v49 = vpop.permute.xlu0 %495 }
 0x9fe   :  { %v498_v50 = vadd.f32 %v496_v49, %v488_v48 }
 0xa00   :  { %1211 = vtanh.f32 %v498_v50 }
 0xa0d   :  { %v1212_v51 = vpop.eup %1211 }
 0xa0e   :  { %501 = vrot.lane.b32.xlu1 %v1212_v51, %s1247_s7 }
 0xa12   :  { %506 = vrot.lane.b32.xlu1 %v498_v50, %s1249_s8 }
 0xa80   :  { %v502_v54 = vpop.permute.xlu1 %501 }
 0xa81   :  { %v504_v55 = vmul.f32 %v1210_v44, %v502_v54  ;;  %v1176_v44 = vld [vmem:[%s1489_s2] sm:$0xff]  }
 0xa83   :  { %511 = vrot.lane.b32.xlu0 %v504_v55, %s1248_s3 }
 0xa84   :  { %v507_v56 = vpop.permute.xlu1 %506 }
 0xa85   :  { %509 = vst.msk [vmem:[#allocation5] sm:$0x3] %vm101_vm0, %v507_v56 }
 0xa8c   :  { %v586_v57 = vld [vmem:[#allocation5] sm:$0x3] }
 0xa8d   :  { %588 = vrot.lane.b32.xlu1 %v586_v57, %s1248_s3 }
 0xaf5   :  { %v512_v58 = vpop.permute.xlu0 %511 }
 0xaf6   :  { %514 = vst.msk [vmem:[#allocation4] sm:$0x3] %vm101_vm0, %v512_v58  ;;  %515 = vst.msk [vmem:[#allocation3 + $0x6] sm:$0x3] %vm101_vm0, %v512_v58 }
 0xafd   :  { %v517_v59 = vld [vmem:[#allocation4] sm:$0x3] }
 0xafe   :  { %v518_v60 = vpack.c.bf16 %v517_v59, %v517_v59 }
 0xaff   :  { %v589_v11 = vpop.permute.xlu1 %588 }
 0xb00   :  { %1120 = vmatmul.mubr.msk.bf16.vlgmr.msra.gmra.mxu1 %vm54_vm2, %v518_v60 }
 0xb01   :  { %1135 = vmatprep.mubr.msk.bf16.mxu1 %vm1246_vm1, %v1245_v0  ;;  %1132 = vmatpush3.bf16.msra.mxu1 %v1175_v43 }
 0xb02   :  { %1133 = vmatprep.subr.bf16.mxu1 %v1245_v0 }
 0xb05   :  { %1134 = vmatpush3.bf16.msra.mxu1 %v1176_v44 }
 0xb06   :  { %1147 = vmatprep.subr.bf16.mxu1 %v1245_v0 }
 0xbc0   :  { %v572_v62 = vpop.f32.mrf.mxu1 }
 0xbc1   :  { %v578_v63 = vadd.f32 %v572_v62, %v516_v61 }
 0xbc2   :  { %v1121_v1 = vpop.f32.mrf.mxu1 }
 0xbc3   :  { %1213 = vtanh.f32 %v578_v63  ;;  %v1028_v5 = vmul.f32 -1.442695, %v578_v63 }
 0xbc4   :  { %v575_v2 = vpop.f32.mrf.mxu1 }
 0xbc5   :  { %1215 = vpow2.f32 %v1028_v5 }
 0xbc6   :  { %v1122_v3 = vpop.f32.mrf.mxu1 }
 0xbd0   :  { %v1214_v4 = vpop.eup %1213 }
 0xbd1   :  { %593 = vrot.lane.b32.xlu0 %v1214_v4, %s1247_s7 }
 0xbd2   :  { %v1216_v6 = vpop.eup %1215 }
 0xbd3   :  { %v582_v7 = vadd.f32 1.0, %v1216_v6 }
 0xbd5   :  { %1217 = vrcp.f32 %v582_v7  ;;  %v1177_v7 = vld [vmem:[%s1489_s2 + $0x8] sm:$0xff]  }
 0xbe2   :  { %v1218_v8 = vpop.eup %1217 }
 0xbe3   :  { %v591_v12 = vmul.f32 %v1218_v8, %v589_v11 }
 0xc43   :  { %v594_v9 = vpop.permute.xlu0 %593 }
 0xc44   :  { %v596_v10 = vmul.f32 %v1218_v8, %v594_v9 }
 0xc46   :  { %598 = vrot.lane.b32.xlu0 %v596_v10, %s1248_s3 }
 0xcb8   :  { %v599_v13 = vpop.permute.xlu0 %598 }
 0xcb9   :  { %v601_v14 = vadd.f32 %v599_v13, %v591_v12 }
 0xcbb   :  { %1219 = vtanh.f32 %v601_v14 }
 0xcc8   :  { %v1220_v15 = vpop.eup %1219 }
 0xcc9   :  { %604 = vrot.lane.b32.xlu1 %v1220_v15, %s1247_s7 }
 0xccd   :  { %609 = vrot.lane.b32.xlu1 %v601_v14, %s1249_s8 }
 0xd3b   :  { %v605_v18 = vpop.permute.xlu1 %604 }
 0xd3c   :  { %v607_v19 = vmul.f32 %v1218_v8, %v605_v18  ;;  %v1178_v8 = vld [vmem:[%s1489_s2] sm:$0xff]  }
 0xd3e   :  { %614 = vrot.lane.b32.xlu0 %v607_v19, %s1248_s3 }
 0xd3f   :  { %v610_v20 = vpop.permute.xlu1 %609 }
 0xd40   :  { %612 = vst.msk [vmem:[#allocation5] sm:$0x3] %vm101_vm0, %v610_v20 }
 0xd47   :  { %v689_v21 = vld [vmem:[#allocation5] sm:$0x3] }
 0xd48   :  { %691 = vrot.lane.b32.xlu1 %v689_v21, %s1248_s3 }
 0xdb0   :  { %v615_v22 = vpop.permute.xlu0 %614 }
 0xdb1   :  { %617 = vst.msk [vmem:[#allocation4] sm:$0x3] %vm101_vm0, %v615_v22  ;;  %618 = vst.msk [vmem:[#allocation3 + $0x8] sm:$0x3] %vm101_vm0, %v615_v22 }
 0xdb8   :  { %v620_v23 = vld [vmem:[#allocation4] sm:$0x3] }
 0xdb9   :  { %v621_v24 = vpack.c.bf16 %v620_v23, %v620_v23 }
 0xdba   :  { %v692_v38 = vpop.permute.xlu1 %691 }
 0xdbb   :  { %1128 = vmatmul.mubr.msk.bf16.vlgmr.msra.gmra.mxu0 %vm54_vm2, %v621_v24 }
 0xdbc   :  { %1143 = vmatprep.mubr.msk.bf16.mxu0 %vm1246_vm1, %v1245_v0  ;;  %1140 = vmatpush3.bf16.msra.mxu0 %v1177_v7 }
 0xdbd   :  { %1141 = vmatprep.subr.bf16.mxu0 %v1245_v0 }
 0xdc0   :  { %1142 = vmatpush3.bf16.msra.mxu0 %v1178_v8 }
 0xe7b   :  { %v675_v26 = vpop.f32.mrf.mxu0 }
 0xe7c   :  { %v681_v27 = vadd.f32 %v675_v26, %v619_v25 }
 0xe7d   :  { %v1129_v28 = vpop.f32.mrf.mxu0 }
 0xe7e   :  { %1221 = vtanh.f32 %v681_v27  ;;  %v1032_v32 = vmul.f32 -1.442695, %v681_v27 }
 0xe7f   :  { %v678_v29 = vpop.f32.mrf.mxu0 }
 0xe80   :  { %1223 = vpow2.f32 %v1032_v32 }
 0xe81   :  { %v1130_v30 = vpop.f32.mrf.mxu0 }
 0xe8b   :  { %v1222_v31 = vpop.eup %1221 }
 0xe8c   :  { %696 = vrot.lane.b32.xlu0 %v1222_v31, %s1247_s7 }
 0xe8d   :  { %v1224_v33 = vpop.eup %1223 }
 0xe8e   :  { %v685_v34 = vadd.f32 1.0, %v1224_v33 }
 0xe90   :  { %1225 = vrcp.f32 %v685_v34  ;;  %v1179_v34 = vld [vmem:[%s1492_s4 + $0x8] sm:$0xff]  }
 0xe9d   :  { %v1226_v35 = vpop.eup %1225 }
 0xe9e   :  { %v694_v39 = vmul.f32 %v1226_v35, %v692_v38 }
 0xefe   :  { %v697_v36 = vpop.permute.xlu0 %696 }
 0xeff   :  { %v699_v37 = vmul.f32 %v1226_v35, %v697_v36 }
 0xf01   :  { %701 = vrot.lane.b32.xlu0 %v699_v37, %s1248_s3 }
 0xf73   :  { %v702_v40 = vpop.permute.xlu0 %701 }
 0xf74   :  { %v704_v41 = vadd.f32 %v702_v40, %v694_v39  ;;  %v928_v40 = vld [vmem:[#allocation3] sm:$0xff] }
 0xf76   :  { %1227 = vtanh.f32 %v704_v41 }
 0xf83   :  { %v1228_v42 = vpop.eup %1227 }
 0xf84   :  { %707 = vrot.lane.b32.xlu1 %v1228_v42, %s1247_s7 }
 0xf88   :  { %712 = vrot.lane.b32.xlu1 %v704_v41, %s1249_s8 }
 0xff6   :  { %v708_v45 = vpop.permute.xlu1 %707 }
 0xff7   :  { %v710_v46 = vmul.f32 %v1226_v35, %v708_v45  ;;  %v1180_v35 = vld [vmem:[%s1492_s4] sm:$0xff]  }
 0xff9   :  { %717 = vrot.lane.b32.xlu0 %v710_v46, %s1248_s3 }
 0xffa   :  { %v713_v47 = vpop.permute.xlu1 %712 }
 0xffb   :  { %715 = vst.msk [vmem:[#allocation5] sm:$0x3] %vm101_vm0, %v713_v47 }
0x1002   :  { %v792_v48 = vld [vmem:[#allocation5] sm:$0x3] }
0x1003   :  { %794 = vrot.lane.b32.xlu1 %v792_v48, %s1248_s3 }
0x106b   :  { %v718_v49 = vpop.permute.xlu0 %717 }
0x106c   :  { %720 = vst.msk [vmem:[#allocation4] sm:$0x3] %vm101_vm0, %v718_v49  ;;  %721 = vst.msk [vmem:[#allocation3 + $0xa] sm:$0x3] %vm101_vm0, %v718_v49 }
0x1073   :  { %v723_v50 = vld [vmem:[#allocation4] sm:$0x3] }
0x1074   :  { %v724_v51 = vpack.c.bf16 %v723_v50, %v723_v50 }
0x1075   :  { %v795_v2 = vpop.permute.xlu1 %794 }
0x1076   :  { %1136 = vmatmul.mubr.msk.bf16.vlgmr.msra.gmra.mxu1 %vm54_vm2, %v724_v51 }
0x1077   :  { %1151 = vmatprep.mubr.msk.bf16.mxu1 %vm1246_vm1, %v1245_v0  ;;  %1148 = vmatpush3.bf16.msra.mxu1 %v1179_v34 }
0x1078   :  { %1149 = vmatprep.subr.bf16.mxu1 %v1245_v0  ;;  %v1041_v0 = vld [vmem:[%s1493_s5] ss:$0 sm:$0xff] }
0x107b   :  { %1150 = vmatpush3.bf16.msra.mxu1 %v1180_v35 }
0x1136   :  { %v778_v53 = vpop.f32.mrf.mxu1 }
0x1137   :  { %v784_v54 = vadd.f32 %v778_v53, %v722_v52 }
0x1138   :  { %v1137_v55 = vpop.f32.mrf.mxu1 }
0x1139   :  { %1229 = vtanh.f32 %v784_v54  ;;  %v1036_v59 = vmul.f32 -1.442695, %v784_v54 }
0x113a   :  { %v781_v56 = vpop.f32.mrf.mxu1 }
0x113b   :  { %1231 = vpow2.f32 %v1036_v59 }
0x113c   :  { %v1138_v57 = vpop.f32.mrf.mxu1 }
0x1146   :  { %v1230_v58 = vpop.eup %1229 }
0x1147   :  { %799 = vrot.lane.b32.xlu0 %v1230_v58, %s1247_s7 }
0x1148   :  { %v1232_v60 = vpop.eup %1231 }
0x1149   :  { %v788_v61 = vadd.f32 1.0, %v1232_v60 }
0x114b   :  { %1233 = vrcp.f32 %v788_v61 }
0x1158   :  { %v1234_v62 = vpop.eup %1233 }
0x1159   :  { %v797_v3 = vmul.f32 %v1234_v62, %v795_v2 }
0x11b9   :  { %v800_v63 = vpop.permute.xlu0 %799 }
0x11ba   :  { %v802_v1 = vmul.f32 %v1234_v62, %v800_v63 }
0x11bc   :  { %804 = vrot.lane.b32.xlu0 %v802_v1, %s1248_s3 }
0x122e   :  { %v805_v4 = vpop.permute.xlu0 %804 }
0x122f   :  { %v807_v5 = vadd.f32 %v805_v4, %v797_v3 }
0x1231   :  { %1235 = vtanh.f32 %v807_v5 }
0x123e   :  { %v1236_v6 = vpop.eup %1235 }
0x123f   :  { %810 = vrot.lane.b32.xlu1 %v1236_v6, %s1247_s7 }
0x1243   :  { %815 = vrot.lane.b32.xlu1 %v807_v5, %s1249_s8 }
0x12b1   :  { %v811_v9 = vpop.permute.xlu1 %810 }
0x12b2   :  { %v813_v10 = vmul.f32 %v1234_v62, %v811_v9 }
0x12b4   :  { %820 = vrot.lane.b32.xlu0 %v813_v10, %s1248_s3 }
0x12b5   :  { %v816_v11 = vpop.permute.xlu1 %815 }
0x12b6   :  { %818 = vst.msk [vmem:[#allocation5] sm:$0x3] %vm101_vm0, %v816_v11 }
0x12bd   :  { %v895_v12 = vld [vmem:[#allocation5] sm:$0x3] }
0x12be   :  { %897 = vrot.lane.b32.xlu1 %v895_v12, %s1248_s3 }
0x1326   :  { %v821_v13 = vpop.permute.xlu0 %820 }
0x1327   :  { %823 = vst.msk [vmem:[#allocation4] sm:$0x3] %vm101_vm0, %v821_v13  ;;  %824 = vst.msk [vmem:[#allocation3 + $0xc] sm:$0x3] %vm101_vm0, %v821_v13 }
0x132e   :  { %v826_v14 = vld [vmem:[#allocation4] sm:$0x3] }
0x132f   :  { %v827_v15 = vpack.c.bf16 %v826_v14, %v826_v14 }
0x1330   :  { %v898_v29 = vpop.permute.xlu1 %897 }
0x1331   :  { %1144 = vmatmul.mubr.msk.bf16.vlgmr.msra.gmra.mxu0 %vm54_vm2, %v827_v15 }
0x13f1   :  { %v881_v17 = vpop.f32.mrf.mxu0 }
0x13f2   :  { %v887_v18 = vadd.f32 %v881_v17, %v825_v16 }
0x13f3   :  { %v1145_v19 = vpop.f32.mrf.mxu0 }
0x13f4   :  { %1237 = vtanh.f32 %v887_v18  ;;  %v1040_v23 = vmul.f32 -1.442695, %v887_v18 }
0x13f5   :  { %v884_v20 = vpop.f32.mrf.mxu0 }
0x13f6   :  { %1239 = vpow2.f32 %v1040_v23 }
0x13f7   :  { %v1146_v21 = vpop.f32.mrf.mxu0 }
0x1401   :  { %v1238_v22 = vpop.eup %1237 }
0x1402   :  { %902 = vrot.lane.b32.xlu0 %v1238_v22, %s1247_s7 }
0x1403   :  { %v1240_v24 = vpop.eup %1239 }
0x1404   :  { %v891_v25 = vadd.f32 1.0, %v1240_v24 }
0x1406   :  { %1241 = vrcp.f32 %v891_v25 }
0x1413   :  { %v1242_v26 = vpop.eup %1241 }
0x1414   :  { %v900_v30 = vmul.f32 %v1242_v26, %v898_v29 }
0x1474   :  { %v903_v27 = vpop.permute.xlu0 %902 }
0x1475   :  { %v905_v28 = vmul.f32 %v1242_v26, %v903_v27 }
0x1477   :  { %907 = vrot.lane.b32.xlu0 %v905_v28, %s1248_s3 }
0x14e9   :  { %v908_v31 = vpop.permute.xlu0 %907 }
0x14ea   :  { %v910_v32 = vadd.f32 %v908_v31, %v900_v30 }
0x14ec   :  { %1243 = vtanh.f32 %v910_v32 }
0x14f9   :  { %v1244_v33 = vpop.eup %1243 }
0x14fa   :  { %913 = vrot.lane.b32.xlu1 %v1244_v33, %s1247_s7 }
0x14fe   :  { %918 = vrot.lane.b32.xlu1 %v910_v32, %s1249_s8 }
0x156c   :  { %v914_v36 = vpop.permute.xlu1 %913 }
0x156d   :  { %v916_v37 = vmul.f32 %v1242_v26, %v914_v36 }
0x156f   :  { %923 = vrot.lane.b32.xlu0 %v916_v37, %s1248_s3 }
0x1570   :  { %v919_v38 = vpop.permute.xlu1 %918 }
0x1571   :  { %921 = vst.msk [vmem:[#allocation5] sm:$0x3] %vm101_vm0, %v919_v38 }
0x15e1   :  { %v924_v39 = vpop.permute.xlu0 %923 }
0x15e2   :  { %926 = vst.msk [vmem:[#allocation4] sm:$0x3] %vm101_vm0, %v924_v39  ;;  %927 = vst.msk [vmem:[#allocation3 + $0xe] sm:$0x3] %vm101_vm0, %v924_v39 }
0x15e9   :  { %v929_v41 = vld [vmem:[#allocation3 + $0x8] sm:$0xff] }
0x15ea   :  { %v930_v42 = vpack.c.bf16 %v929_v41, %v928_v40 }
0x15ec   :  { %1152 = vmatmul.mubr.msk.bf16.vlgmr.msra.gmra.mxu1 %vm54_vm2, %v930_v42 }
0x16ac   :  { %v991_v43 = vpop.f32.mrf.mxu1 }
0x16ad   :  { %v992_v44 = vadd.f32 %v1041_v0, %v991_v43 }
0x16ae   :  { %v1153_v45 = vpop.f32.mrf.mxu1 }
0x16af   :  { %998 = vst.msk [vmem:[%s1494_s6] sm:$0xff] %vm54_vm2, %v992_v44 }
0x16b0   :  { %v994_v46 = vpop.f32.mrf.mxu1 }
0x16b1   :  { %v995_v47 = vadd.f32 %v1041_v0, %v994_v46 }
0x16b2   :  { %v1154_v48 = vpop.f32.mrf.mxu1 }
0x16b3   :  { %999 = vst.msk [vmem:[%s1494_s6 + $0x8] sm:$0xff] %vm54_vm2, %v995_v47 }

</bundles_post_ra>
